<compile_context>
chip_gen: v7x
topology: tpu7x:2x2x1
jax: 0.10.0
libtpu: 0.0.40
codegen_flags: <defaults>
</compile_context>

<pallas_src>
import functools

import jax
import jax.numpy as jnp
import numpy as np
from jax.experimental import pallas as pl
from jax.experimental.pallas import tpu as pltpu

_SUBLANE = 8      # f32 sublane tile
_LANE = 128       # lane tile

# Entries of the packed weight slab (bf16, each at a 16-aligned row offset).
WEIGHT_ORDER = (
    "es_w1", "es_w2",          # enc_s  : mlp(obs_dim, hidden, state_dim)
    "ih_w1", "ih_w2",          # init_h : mlp(state_dim, hidden, hidden)
    "ea_w1", "ea_w2",          # enc_a  : mlp(action_dim, hidden, hidden)
    "w_i",                     # GRU input gates fused [w_ir|w_iz|w_in]   (H, 3H)
    "w_hr", "w_hz", "w_hn",    # GRU hidden gates kept separate (per-gate matmuls)
    "sd_w1", "sd_w2",          # state_dec : mlp(hidden, hidden, state_dim)
    "rw_w1s", "rw_w1a",        # reward 1st layer split: state part / a_embed part
    "rw_w2p",                  # reward 2nd layer, zero-padded to 128 lane columns
)
# Entries of the packed bias slab (f32, each at a 128-aligned column offset).
BIAS_ORDER = (
    "es_b1", "es_b2", "ih_b1", "ih_b2", "ea_b1", "ea_b2",
    "b_i",                     # [b_ir+b_hr | b_iz+b_hz | b_in]   (1, 3H)
    "b_hn",                    # stays separate (inside the r-gated GRU "new" term)
    "sd_b1", "sd_b2", "rw_b1", "rw_b2p",
)


def _round_up(x, m):
    return (x + m - 1) // m * m


# --------------------------------------------------------------------------------
# Wrapper-time parameter fusion / packing (plain JAX, done once per call)
# --------------------------------------------------------------------------------
def _fuse_params(params):
    f = dict(params)
    f["w_i"] = jnp.concatenate(
        [params["w_ir"], params["w_iz"], params["w_in"]], axis=1)            # (H, 3H)
    f["b_i"] = jnp.concatenate(
        [params["b_ir"] + params["b_hr"],
         params["b_iz"] + params["b_hz"],
         params["b_in"]], axis=1)                                            # (1, 3H)
    # Zero-pad the reward head to a full 128-lane output block so the final MXU
    # matmul directly produces the lane-dense [reward | 0...0] slab column group.
    hidden = params["rw_w2"].shape[0]
    f["rw_w2p"] = jnp.concatenate(
        [params["rw_w2"], jnp.zeros((hidden, _LANE - 1), jnp.float32)], axis=1)
    f["rw_b2p"] = jnp.concatenate(
        [params["rw_b2"], jnp.zeros((1, _LANE - 1), jnp.float32)], axis=1)
    return f


def _pack_weight_slab(fused):
    """All weights in one (rows, 128) bf16 slab; each entry at a 16-aligned row."""
    offs, blocks, row = {}, [], 0
    for name in WEIGHT_ORDER:
        w = fused[name]
        r, c = w.shape
        assert c <= _LANE, name
        rp = _round_up(r, 16)                       # bf16 sublane tile = 16 rows
        blk = jnp.zeros((rp, _LANE), jnp.float32).at[:r, :c].set(w)
        blocks.append(blk)
        offs[name] = (row, r, c)
        row += rp
    slab = jnp.concatenate(blocks, axis=0).astype(jnp.bfloat16)
    return slab, offs


def _pack_bias_slab(fused):
    """All biases in one (1, n*128) f32 slab at 128-aligned column offsets."""
    offs, blocks = {}, []
    for i, name in enumerate(BIAS_ORDER):
        b = fused[name]
        c = b.shape[1]
        assert c <= _LANE, name
        blocks.append(
            jnp.concatenate([b, jnp.zeros((1, _LANE - c), jnp.float32)], axis=1))
        offs[name] = (i * _LANE, c)
    return jnp.concatenate(blocks, axis=1), offs


# --------------------------------------------------------------------------------
# Kernel
# --------------------------------------------------------------------------------
def _worldmodel_kernel(T, Bp, D, H, w_offs, b_offs,
                       obs_ref, a_ref, w_ref, b_ref, out_ref):
    f32 = jnp.float32

    def W(name):                         # bf16 weight view (static slice, no copy cost)
        off, r, c = w_offs[name]
        return w_ref[off:off + r, 0:c]

    def Bv(name):                        # f32 bias, (1, c), 128-aligned column slice
        off, c = b_offs[name]
        return b_ref[:, off:off + c]

    def dot(x, w):                       # bf16 MXU operands, f32 accumulate
        return jnp.dot(x.astype(jnp.bfloat16), w, preferred_element_type=f32)

    def mlp(x, w1, b1, w2, b2):          # tools.utils.mlp == Linear -> ReLU -> Linear
        hid = jnp.maximum(dot(x, W(w1)) + Bv(b1), 0.0)
        return dot(hid, W(w2)) + Bv(b2)

    # ---- time-parallel prologue: bulk MXU work hoisted out of the recurrence ----
    s0 = mlp(obs_ref[...], "es_w1", "es_b1", "es_w2", "es_b2")       # enc_s, (Bp, D)
    h = mlp(s0, "ih_w1", "ih_b1", "ih_w2", "ih_b2")                  # init_h, (Bp, H)

    a_emb_all = mlp(a_ref[...], "ea_w1", "ea_b1", "ea_w2", "ea_b2")  # enc_a, (T*Bp, H)

    # Input-gate pre-activations for every step in one (T*Bp,H)@(H,3H) matmul.
    # b_i already holds b_ir+b_hr and b_iz+b_hz (pre-summed in the wrapper).
    # The per-gate slices happen ONCE here, off the serial critical path.
    gi_all = dot(a_emb_all, W("w_i")) + Bv("b_i")                    # (T*Bp, 3H)
    gi_r = gi_all[:, 0:H]
    gi_z = gi_all[:, H:2 * H]
    gi_n = gi_all[:, 2 * H:3 * H]

    # Loop-invariant weight views / bias broadcast hoisted above the recurrence.
    w_hr, w_hz, w_hn = W("w_hr"), W("w_hz"), W("w_hn")               # bf16 (H, H)
    b_hn = jnp.broadcast_to(Bv("b_hn"), (Bp, H))

    # ---- serial GRU recurrence: 3 tiny per-gate bf16 matmuls + f32 gate math ----
    # Per-gate (H,H) matmuls keep every gate at lane offset 0 (no 32/64-lane slice
    # shuffles on the critical path).  Hidden states stay in vregs and are stacked
    # after the loop (no per-step scratch stores).
    hs = []
    for t in range(T):                                  # T small & static -> unrolled
        rows = slice(t * Bp, (t + 1) * Bp)              # 8-aligned sublane slice
        hb = h.astype(jnp.bfloat16)
        gh_r = jnp.dot(hb, w_hr, preferred_element_type=f32)
        gh_z = jnp.dot(hb, w_hz, preferred_element_type=f32)
        gh_n = jnp.dot(hb, w_hn, preferred_element_type=f32)
        r = jax.nn.sigmoid(gi_r[rows] + gh_r)
        z = jax.nn.sigmoid(gi_z[rows] + gh_z)
        n = jnp.tanh(gi_n[rows] + r * (gh_n + b_hn))
        h = (1.0 - z) * n + z * h                       # gate math stays f32 (v5e)
        hs.append(h)
    h_all = jnp.concatenate(hs, axis=0)                 # (T*Bp, H), sublane-aligned

    # ---- time-parallel epilogue: bulk decode + reward head ----------------------
    s_all = mlp(h_all, "sd_w1", "sd_b1", "sd_w2", "sd_b2")           # (T*Bp, D)
    rh = jnp.maximum(dot(s_all, W("rw_w1s")) + dot(a_emb_all, W("rw_w1a"))
                     + Bv("rw_b1"), 0.0)
    rew_blk = dot(rh, W("rw_w2p")) + Bv("rw_b2p")       # (T*Bp, 128): [reward | 0...0]

    # ---- single merged output slab (one writeback DMA) --------------------------
    # Column blocks are 128-aligned so every store is at lane offset 0 of its block
    # (no lane relayouts); the reward block is a full-width unmasked store.
    # Unwritten columns of the slab are never read by the wrapper.
    out_ref[0:Bp, 0:D] = s0                             # s0 block (rows 0:Bp)
    out_ref[Bp:, 0:D] = s_all                           # states 1..T
    out_ref[Bp:, _LANE:_LANE + H] = a_emb_all           # a_embed
    out_ref[Bp:, 2 * _LANE:] = rew_blk                  # reward (+ zero pad)


# --------------------------------------------------------------------------------
# Wrapper: mirrors GeneralizedQ.inference with a_seq / z_seq provided (no sampling)
# --------------------------------------------------------------------------------
def hidden_dynamic_net_inference(obs, a_seq, timestep, z_seq, params, gamma=0.99):
    T, B, A = a_seq.shape
    D = params["es_w2"].shape[1]          # state_dim
    H = params["ea_w2"].shape[1]          # hidden_dim
    assert D <= _LANE and H <= _LANE

    # Pad the batch to a full f32 sublane tile so every per-step row access in the
    # serial GRU chain is tile-aligned; padded rows are sliced away afterwards.
    Bp = _round_up(max(B, 1), _SUBLANE)
    obs_p = jnp.zeros((Bp, obs.shape[1]), jnp.float32).at[:B].set(obs)
    a_p = (jnp.zeros((T, Bp, A), jnp.float32).at[:, :B].set(a_seq)
           .reshape(T * Bp, A))

    fused = _fuse_params(params)
    w_slab, w_offs = _pack_weight_slab(fused)     # one bf16 weight DMA
    b_slab, b_offs = _pack_bias_slab(fused)       # one f32 bias DMA

    out_cols = 3 * _LANE                          # [state | a_embed | reward] blocks
    vmem = pl.BlockSpec(memory_space=pltpu.MemorySpace.VMEM)

    # Grid-free, everything VMEM-resident (4 input DMAs, 1 output DMA).
    # TODO(synk): at production batch sizes add a 'parallel' grid axis over B with
    # BlockSpec tiling so v7x's two TensorCores split the rollout batch and the
    # working set stays bounded under its 64 MiB VMEM; grid-free is right at demo size.
    slab = pl.pallas_call(
        functools.partial(_worldmodel_kernel, T, Bp, D, H, w_offs, b_offs),
        out_shape=jax.ShapeDtypeStruct(((T + 1) * Bp, out_cols), jnp.float32),
        in_specs=[vmem, vmem, vmem, vmem],
        out_specs=vmem,
        compiler_params=pltpu.CompilerParams(
            vmem_limit_bytes=32 * 1024 * 1024),   # guard only; safe on v5e/v6e/v7x
    )(obs_p, a_p, w_slab, b_slab)

    # Layout plumbing back to the module's output shapes (plain JAX, cheap).
    s0 = slab[:B, :D]
    rest = slab[Bp:].reshape(T, Bp, out_cols)
    states = jnp.concatenate([s0[None], rest[:, :B, :D]], axis=0)     # (T+1, B, D)
    a_embed = rest[:, :B, _LANE:_LANE + H]                            # (T, B, H)
    reward = rest[:, :B, 2 * _LANE:2 * _LANE + 1]                     # (T, B, 1)

    # ts[i] = timestep + i  (glue, plain JAX)
    ts = timestep[None, :] + jnp.arange(T, dtype=timestep.dtype)[:, None]

    # TODO(synk): q_fn (SoftQPolicy / ValuePolicy) is not defined in the reference
    # snippet, so traj['q_value'] / 'pred_values' and the sample_z-only vpreds /
    # lambda-mixture 'value' are not reproduced here.
    return dict(
        init_timestep=timestep,
        state=states,
        a_embed=a_embed,
        timestep=ts,
        a=a_seq,
        z=z_seq,
        reward=reward,
        done=None,            # have_done=False -> done_fn is None
    )


# --------------------------------------------------------------------------------
# Synthetic parameters + pure-JAX reference
# --------------------------------------------------------------------------------
def init_params(key, obs_dim, action_dim, state_dim, hidden_dim):
    """Deterministic synthetic parameters (shapes from HiddenDynamicNet.__init__)."""
    keys = iter(jax.random.split(key, 80))

    def lin(i, o, scale=1.0):
        w = scale * jax.random.normal(next(keys), (i, o), jnp.float32) / jnp.sqrt(i)
        b = 0.1 * jax.random.normal(next(keys), (1, o), jnp.float32)
        return w, b

    p = {}
    p["es_w1"], p["es_b1"] = lin(obs_dim, hidden_dim)
    p["es_w2"], p["es_b2"] = lin(hidden_dim, state_dim)
    p["ih_w1"], p["ih_b1"] = lin(state_dim, hidden_dim)
    p["ih_w2"], p["ih_b2"] = lin(hidden_dim, hidden_dim)
    p["ea_w1"], p["ea_b1"] = lin(action_dim, hidden_dim)
    p["ea_w2"], p["ea_b2"] = lin(hidden_dim, hidden_dim)
    for g in ("r", "z", "n"):
        p[f"w_i{g}"], p[f"b_i{g}"] = lin(hidden_dim, hidden_dim)
        p[f"w_h{g}"], p[f"b_h{g}"] = lin(hidden_dim, hidden_dim)
    p["sd_w1"], p["sd_b1"] = lin(hidden_dim, hidden_dim)
    p["sd_w2"], p["sd_b2"] = lin(hidden_dim, state_dim)
    p["rw_w1s"], p["rw_b1"] = lin(state_dim, hidden_dim)
    p["rw_w1a"], _ = lin(hidden_dim, hidden_dim)
    p["rw_w2"], p["rw_b2"] = lin(hidden_dim, 1)
    return p


def reference_forward(obs, a_seq, p):
    """Pure-JAX reference with the SAME matmul numerics as the kernel (bf16 MXU
    operands, f32 accumulate) but UN-fused parameters -- validates the GRU gate
    fusion, parameter slab packing, batch padding and output-slab layout."""
    def dot(x, w):
        return jnp.dot(x.astype(jnp.bfloat16), w.astype(jnp.bfloat16),
                       preferred_element_type=jnp.float32)

    def mlp(x, w1, b1, w2, b2):
        return dot(jnp.maximum(dot(x, w1) + b1, 0.0), w2) + b2

    s = mlp(obs, p["es_w1"], p["es_b1"], p["es_w2"], p["es_b2"])
    h = mlp(s, p["ih_w1"], p["ih_b1"], p["ih_w2"], p["ih_b2"])
    states, aembs, rewards = [s], [], []
    for t in range(a_seq.shape[0]):
        a_emb = mlp(a_seq[t], p["ea_w1"], p["ea_b1"], p["ea_w2"], p["ea_b2"])
        r = jax.nn.sigmoid(dot(a_emb, p["w_ir"]) + p["b_ir"]
                           + dot(h, p["w_hr"]) + p["b_hr"])
        z = jax.nn.sigmoid(dot(a_emb, p["w_iz"]) + p["b_iz"]
                           + dot(h, p["w_hz"]) + p["b_hz"])
        n = jnp.tanh(dot(a_emb, p["w_in"]) + p["b_in"]
                     + r * (dot(h, p["w_hn"]) + p["b_hn"]))
        h = (1.0 - z) * n + z * h
        s = mlp(h, p["sd_w1"], p["sd_b1"], p["sd_w2"], p["sd_b2"])
        rh = jnp.maximum(
            dot(jnp.concatenate([s, a_emb], axis=1),
                jnp.concatenate([p["rw_w1s"], p["rw_w1a"]], axis=0)) + p["rw_b1"],
            0.0)
        rewards.append(dot(rh, p["rw_w2"]) + p["rw_b2"])
        states.append(s)
        aembs.append(a_emb)
    return jnp.stack(states), jnp.stack(aembs), jnp.stack(rewards)


if __name__ == "__main__":
    # Small shapes consistent with the module's forward
    B, T = 4, 6
    obs_dim, action_dim, state_dim, hidden_dim, z_dim = 12, 6, 16, 32, 4

    key = jax.random.PRNGKey(0)
    k_obs, k_a, k_z, k_p = jax.random.split(key, 4)
    obs = jax.random.normal(k_obs, (B, obs_dim), jnp.float32)
    a_seq = jax.random.normal(k_a, (T, B, action_dim), jnp.float32)
    z_seq = jax.random.normal(k_z, (T, B, z_dim), jnp.float32)
    timestep = jnp.zeros((B,), jnp.int32)

    params = init_params(k_p, obs_dim, action_dim, state_dim, hidden_dim)

    out = hidden_dynamic_net_inference(obs, a_seq, timestep, z_seq, params)
    jax.block_until_ready(out["state"])
    jax.block_until_ready(out["a_embed"])
    jax.block_until_ready(out["reward"])

    ref_state, ref_aemb, ref_reward = reference_forward(obs, a_seq, params)
    # The reference uses the same bf16-operand / f32-accumulate matmul numerics, so
    # only summation-order differences remain (gate-bias pre-fusion, fused w_i,
    # split reward first layer, zero-padded columns); 1e-2 comfortably covers them
    # while still catching any fusion / padding / slab-layout bug.
    np.testing.assert_allclose(np.asarray(out["state"]), np.asarray(ref_state),
                               rtol=1e-2, atol=1e-2)
    np.testing.assert_allclose(np.asarray(out["a_embed"]), np.asarray(ref_aemb),
                               rtol=1e-2, atol=1e-2)
    np.testing.assert_allclose(np.asarray(out["reward"]), np.asarray(ref_reward),
                               rtol=1e-2, atol=1e-2)

    print("KERNEL_OK")
</pallas_src>

<mosaic_0001>
module attributes {stable_mosaic.version = 11 : i64} {
  func.func @_worldmodel_kernel(%arg0: memref<8x12xf32, #tpu.memory_space<vmem>>, %arg1: memref<48x6xf32, #tpu.memory_space<vmem>>, %arg2: memref<416x128xbf16, #tpu.memory_space<vmem>>, %arg3: memref<1x1536xf32, #tpu.memory_space<vmem>>, %arg4: memref<56x384xf32, #tpu.memory_space<vmem>>) attributes {dimension_semantics = [], scalar_prefetch = 0 : i64, scratch_operands = 0 : i64, tpu.core_type = #tpu.core_type<tc>} {
    %c0 = arith.constant 0 : index
    %c0_0 = arith.constant 0 : index
    %0 = vector.load %arg0[%c0, %c0_0] : memref<8x12xf32, #tpu.memory_space<vmem>>, vector<8x12xf32>
    %c0_1 = arith.constant 0 : index
    %c0_2 = arith.constant 0 : index
    %1 = vector.load %arg2[%c0_1, %c0_2] : memref<416x128xbf16, #tpu.memory_space<vmem>>, vector<12x32xbf16>
    %2 = arith.truncf %0 : vector<8x12xf32> to vector<8x12xbf16>
    %cst = arith.constant dense<0.000000e+00> : vector<8x32xf32>
    %3 = tpu.matmul %2, %1, %cst {dimension_numbers = #tpu.dot_dimension_numbers<[1], [0], [0], [1], [0, 0, 1, 1], [], []>} : vector<8x12xbf16>, vector<12x32xbf16>, vector<8x32xf32> -> vector<8x32xf32>
    %c0_3 = arith.constant 0 : index
    %c0_4 = arith.constant 0 : index
    %4 = vector.load %arg3[%c0_3, %c0_4] : memref<1x1536xf32, #tpu.memory_space<vmem>>, vector<1x32xf32>
    %5 = vector.broadcast %4 : vector<1x32xf32> to vector<8x32xf32>
    %6 = arith.addf %3, %5 : vector<8x32xf32>
    %cst_5 = arith.constant 0.000000e+00 : f32
    %7 = vector.broadcast %cst_5 : f32 to vector<8x32xf32>
    %8 = arith.maximumf %6, %7 : vector<8x32xf32>
    %c16 = arith.constant 16 : index
    %c0_6 = arith.constant 0 : index
    %9 = vector.load %arg2[%c16, %c0_6] : memref<416x128xbf16, #tpu.memory_space<vmem>>, vector<32x16xbf16>
    %10 = arith.truncf %8 : vector<8x32xf32> to vector<8x32xbf16>
    %cst_7 = arith.constant dense<0.000000e+00> : vector<8x16xf32>
    %11 = tpu.matmul %10, %9, %cst_7 {dimension_numbers = #tpu.dot_dimension_numbers<[1], [0], [0], [1], [0, 0, 1, 1], [], []>} : vector<8x32xbf16>, vector<32x16xbf16>, vector<8x16xf32> -> vector<8x16xf32>
    %c0_8 = arith.constant 0 : index
    %c128 = arith.constant 128 : index
    %12 = vector.load %arg3[%c0_8, %c128] : memref<1x1536xf32, #tpu.memory_space<vmem>>, vector<1x16xf32>
    %13 = vector.broadcast %12 : vector<1x16xf32> to vector<8x16xf32>
    %14 = arith.addf %11, %13 : vector<8x16xf32>
    %c48 = arith.constant 48 : index
    %c0_9 = arith.constant 0 : index
    %15 = vector.load %arg2[%c48, %c0_9] : memref<416x128xbf16, #tpu.memory_space<vmem>>, vector<16x32xbf16>
    %16 = arith.truncf %14 : vector<8x16xf32> to vector<8x16xbf16>
    %cst_10 = arith.constant dense<0.000000e+00> : vector<8x32xf32>
    %17 = tpu.matmul %16, %15, %cst_10 {dimension_numbers = #tpu.dot_dimension_numbers<[1], [0], [0], [1], [0, 0, 1, 1], [], []>} : vector<8x16xbf16>, vector<16x32xbf16>, vector<8x32xf32> -> vector<8x32xf32>
    %c0_11 = arith.constant 0 : index
    %c256 = arith.constant 256 : index
    %18 = vector.load %arg3[%c0_11, %c256] : memref<1x1536xf32, #tpu.memory_space<vmem>>, vector<1x32xf32>
    %19 = vector.broadcast %18 : vector<1x32xf32> to vector<8x32xf32>
    %20 = arith.addf %17, %19 : vector<8x32xf32>
    %cst_12 = arith.constant 0.000000e+00 : f32
    %21 = vector.broadcast %cst_12 : f32 to vector<8x32xf32>
    %22 = arith.maximumf %20, %21 : vector<8x32xf32>
    %c64 = arith.constant 64 : index
    %c0_13 = arith.constant 0 : index
    %23 = vector.load %arg2[%c64, %c0_13] : memref<416x128xbf16, #tpu.memory_space<vmem>>, vector<32x32xbf16>
    %24 = arith.truncf %22 : vector<8x32xf32> to vector<8x32xbf16>
    %cst_14 = arith.constant dense<0.000000e+00> : vector<8x32xf32>
    %25 = tpu.matmul %24, %23, %cst_14 {dimension_numbers = #tpu.dot_dimension_numbers<[1], [0], [0], [1], [0, 0, 1, 1], [], []>} : vector<8x32xbf16>, vector<32x32xbf16>, vector<8x32xf32> -> vector<8x32xf32>
    %c0_15 = arith.constant 0 : index
    %c384 = arith.constant 384 : index
    %26 = vector.load %arg3[%c0_15, %c384] : memref<1x1536xf32, #tpu.memory_space<vmem>>, vector<1x32xf32>
    %27 = vector.broadcast %26 : vector<1x32xf32> to vector<8x32xf32>
    %28 = arith.addf %25, %27 : vector<8x32xf32>
    %c0_16 = arith.constant 0 : index
    %c0_17 = arith.constant 0 : index
    %29 = vector.load %arg1[%c0_16, %c0_17] : memref<48x6xf32, #tpu.memory_space<vmem>>, vector<48x6xf32>
    %c96 = arith.constant 96 : index
    %c0_18 = arith.constant 0 : index
    %30 = vector.load %arg2[%c96, %c0_18] : memref<416x128xbf16, #tpu.memory_space<vmem>>, vector<6x32xbf16>
    %31 = arith.truncf %29 : vector<48x6xf32> to vector<48x6xbf16>
    %cst_19 = arith.constant dense<0.000000e+00> : vector<48x32xf32>
    %32 = tpu.matmul %31, %30, %cst_19 {dimension_numbers = #tpu.dot_dimension_numbers<[1], [0], [0], [1], [0, 0, 1, 1], [], []>} : vector<48x6xbf16>, vector<6x32xbf16>, vector<48x32xf32> -> vector<48x32xf32>
    %c0_20 = arith.constant 0 : index
    %c512 = arith.constant 512 : index
    %33 = vector.load %arg3[%c0_20, %c512] : memref<1x1536xf32, #tpu.memory_space<vmem>>, vector<1x32xf32>
    %34 = vector.broadcast %33 : vector<1x32xf32> to vector<48x32xf32>
    %35 = arith.addf %32, %34 : vector<48x32xf32>
    %cst_21 = arith.constant 0.000000e+00 : f32
    %36 = vector.broadcast %cst_21 : f32 to vector<48x32xf32>
    %37 = arith.maximumf %35, %36 : vector<48x32xf32>
    %c112 = arith.constant 112 : index
    %c0_22 = arith.constant 0 : index
    %38 = vector.load %arg2[%c112, %c0_22] : memref<416x128xbf16, #tpu.memory_space<vmem>>, vector<32x32xbf16>
    %39 = arith.truncf %37 : vector<48x32xf32> to vector<48x32xbf16>
    %cst_23 = arith.constant dense<0.000000e+00> : vector<48x32xf32>
    %40 = tpu.matmul %39, %38, %cst_23 {dimension_numbers = #tpu.dot_dimension_numbers<[1], [0], [0], [1], [0, 0, 1, 1], [], []>} : vector<48x32xbf16>, vector<32x32xbf16>, vector<48x32xf32> -> vector<48x32xf32>
    %c0_24 = arith.constant 0 : index
    %c640 = arith.constant 640 : index
    %41 = vector.load %arg3[%c0_24, %c640] : memref<1x1536xf32, #tpu.memory_space<vmem>>, vector<1x32xf32>
    %42 = vector.broadcast %41 : vector<1x32xf32> to vector<48x32xf32>
    %43 = arith.addf %40, %42 : vector<48x32xf32>
    %c144 = arith.constant 144 : index
    %c0_25 = arith.constant 0 : index
    %44 = vector.load %arg2[%c144, %c0_25] : memref<416x128xbf16, #tpu.memory_space<vmem>>, vector<32x96xbf16>
    %45 = arith.truncf %43 : vector<48x32xf32> to vector<48x32xbf16>
    %cst_26 = arith.constant dense<0.000000e+00> : vector<48x96xf32>
    %46 = tpu.matmul %45, %44, %cst_26 {dimension_numbers = #tpu.dot_dimension_numbers<[1], [0], [0], [1], [0, 0, 1, 1], [], []>} : vector<48x32xbf16>, vector<32x96xbf16>, vector<48x96xf32> -> vector<48x96xf32>
    %c0_27 = arith.constant 0 : index
    %c768 = arith.constant 768 : index
    %47 = vector.load %arg3[%c0_27, %c768] : memref<1x1536xf32, #tpu.memory_space<vmem>>, vector<1x96xf32>
    %48 = vector.broadcast %47 : vector<1x96xf32> to vector<48x96xf32>
    %49 = arith.addf %46, %48 : vector<48x96xf32>
    %50 = vector.extract_strided_slice %49 {offsets = [0, 0], sizes = [48, 32], strides = [1, 1]} : vector<48x96xf32> to vector<48x32xf32>
    %51 = vector.extract_strided_slice %49 {offsets = [0, 32], sizes = [48, 32], strides = [1, 1]} : vector<48x96xf32> to vector<48x32xf32>
    %52 = vector.extract_strided_slice %49 {offsets = [0, 64], sizes = [48, 32], strides = [1, 1]} : vector<48x96xf32> to vector<48x32xf32>
    %c176 = arith.constant 176 : index
    %c0_28 = arith.constant 0 : index
    %53 = vector.load %arg2[%c176, %c0_28] : memref<416x128xbf16, #tpu.memory_space<vmem>>, vector<32x32xbf16>
    %c208 = arith.constant 208 : index
    %c0_29 = arith.constant 0 : index
    %54 = vector.load %arg2[%c208, %c0_29] : memref<416x128xbf16, #tpu.memory_space<vmem>>, vector<32x32xbf16>
    %c240 = arith.constant 240 : index
    %c0_30 = arith.constant 0 : index
    %55 = vector.load %arg2[%c240, %c0_30] : memref<416x128xbf16, #tpu.memory_space<vmem>>, vector<32x32xbf16>
    %c0_31 = arith.constant 0 : index
    %c896 = arith.constant 896 : index
    %56 = vector.load %arg3[%c0_31, %c896] : memref<1x1536xf32, #tpu.memory_space<vmem>>, vector<1x32xf32>
    %57 = vector.shape_cast %56 : vector<1x32xf32> to vector<1x32xf32>
    %58 = vector.broadcast %57 : vector<1x32xf32> to vector<8x32xf32>
    %59 = arith.truncf %28 : vector<8x32xf32> to vector<8x32xbf16>
    %cst_32 = arith.constant dense<0.000000e+00> : vector<8x32xf32>
    %60 = tpu.matmul %59, %53, %cst_32 {dimension_numbers = #tpu.dot_dimension_numbers<[1], [0], [0], [1], [0, 0, 1, 1], [], []>} : vector<8x32xbf16>, vector<32x32xbf16>, vector<8x32xf32> -> vector<8x32xf32>
    %cst_33 = arith.constant dense<0.000000e+00> : vector<8x32xf32>
    %61 = tpu.matmul %59, %54, %cst_33 {dimension_numbers = #tpu.dot_dimension_numbers<[1], [0], [0], [1], [0, 0, 1, 1], [], []>} : vector<8x32xbf16>, vector<32x32xbf16>, vector<8x32xf32> -> vector<8x32xf32>
    %cst_34 = arith.constant dense<0.000000e+00> : vector<8x32xf32>
    %62 = tpu.matmul %59, %55, %cst_34 {dimension_numbers = #tpu.dot_dimension_numbers<[1], [0], [0], [1], [0, 0, 1, 1], [], []>} : vector<8x32xbf16>, vector<32x32xbf16>, vector<8x32xf32> -> vector<8x32xf32>
    %63 = vector.extract_strided_slice %50 {offsets = [0, 0], sizes = [8, 32], strides = [1, 1]} : vector<48x32xf32> to vector<8x32xf32>
    %64 = arith.addf %63, %60 : vector<8x32xf32>
    %65 = arith.negf %64 : vector<8x32xf32>
    %66 = math.exp %65 : vector<8x32xf32>
    %cst_35 = arith.constant 1.000000e+00 : f32
    %67 = vector.broadcast %cst_35 : f32 to vector<8x32xf32>
    %68 = arith.addf %67, %66 : vector<8x32xf32>
    %69 = arith.divf %67, %68 : vector<8x32xf32>
    %70 = vector.extract_strided_slice %51 {offsets = [0, 0], sizes = [8, 32], strides = [1, 1]} : vector<48x32xf32> to vector<8x32xf32>
    %71 = arith.addf %70, %61 : vector<8x32xf32>
    %72 = arith.negf %71 : vector<8x32xf32>
    %73 = math.exp %72 : vector<8x32xf32>
    %cst_36 = arith.constant 1.000000e+00 : f32
    %74 = vector.broadcast %cst_36 : f32 to vector<8x32xf32>
    %75 = arith.addf %74, %73 : vector<8x32xf32>
    %76 = arith.divf %74, %75 : vector<8x32xf32>
    %77 = vector.extract_strided_slice %52 {offsets = [0, 0], sizes = [8, 32], strides = [1, 1]} : vector<48x32xf32> to vector<8x32xf32>
    %78 = arith.addf %62, %58 : vector<8x32xf32>
    %79 = arith.mulf %69, %78 : vector<8x32xf32>
    %80 = arith.addf %77, %79 : vector<8x32xf32>
    %81 = math.tanh %80 : vector<8x32xf32>
    %cst_37 = arith.constant 1.000000e+00 : f32
    %82 = vector.broadcast %cst_37 : f32 to vector<8x32xf32>
    %83 = arith.subf %82, %76 : vector<8x32xf32>
    %84 = arith.mulf %83, %81 : vector<8x32xf32>
    %85 = arith.mulf %76, %28 : vector<8x32xf32>
    %86 = arith.addf %84, %85 : vector<8x32xf32>
    %87 = arith.truncf %86 : vector<8x32xf32> to vector<8x32xbf16>
    %cst_38 = arith.constant dense<0.000000e+00> : vector<8x32xf32>
    %88 = tpu.matmul %87, %53, %cst_38 {dimension_numbers = #tpu.dot_dimension_numbers<[1], [0], [0], [1], [0, 0, 1, 1], [], []>} : vector<8x32xbf16>, vector<32x32xbf16>, vector<8x32xf32> -> vector<8x32xf32>
    %cst_39 = arith.constant dense<0.000000e+00> : vector<8x32xf32>
    %89 = tpu.matmul %87, %54, %cst_39 {dimension_numbers = #tpu.dot_dimension_numbers<[1], [0], [0], [1], [0, 0, 1, 1], [], []>} : vector<8x32xbf16>, vector<32x32xbf16>, vector<8x32xf32> -> vector<8x32xf32>
    %cst_40 = arith.constant dense<0.000000e+00> : vector<8x32xf32>
    %90 = tpu.matmul %87, %55, %cst_40 {dimension_numbers = #tpu.dot_dimension_numbers<[1], [0], [0], [1], [0, 0, 1, 1], [], []>} : vector<8x32xbf16>, vector<32x32xbf16>, vector<8x32xf32> -> vector<8x32xf32>
    %91 = vector.extract_strided_slice %50 {offsets = [8, 0], sizes = [8, 32], strides = [1, 1]} : vector<48x32xf32> to vector<8x32xf32>
    %92 = arith.addf %91, %88 : vector<8x32xf32>
    %93 = arith.negf %92 : vector<8x32xf32>
    %94 = math.exp %93 : vector<8x32xf32>
    %cst_41 = arith.constant 1.000000e+00 : f32
    %95 = vector.broadcast %cst_41 : f32 to vector<8x32xf32>
    %96 = arith.addf %95, %94 : vector<8x32xf32>
    %97 = arith.divf %95, %96 : vector<8x32xf32>
    %98 = vector.extract_strided_slice %51 {offsets = [8, 0], sizes = [8, 32], strides = [1, 1]} : vector<48x32xf32> to vector<8x32xf32>
    %99 = arith.addf %98, %89 : vector<8x32xf32>
    %100 = arith.negf %99 : vector<8x32xf32>
    %101 = math.exp %100 : vector<8x32xf32>
    %cst_42 = arith.constant 1.000000e+00 : f32
    %102 = vector.broadcast %cst_42 : f32 to vector<8x32xf32>
    %103 = arith.addf %102, %101 : vector<8x32xf32>
    %104 = arith.divf %102, %103 : vector<8x32xf32>
    %105 = vector.extract_strided_slice %52 {offsets = [8, 0], sizes = [8, 32], strides = [1, 1]} : vector<48x32xf32> to vector<8x32xf32>
    %106 = arith.addf %90, %58 : vector<8x32xf32>
    %107 = arith.mulf %97, %106 : vector<8x32xf32>
    %108 = arith.addf %105, %107 : vector<8x32xf32>
    %109 = math.tanh %108 : vector<8x32xf32>
    %cst_43 = arith.constant 1.000000e+00 : f32
    %110 = vector.broadcast %cst_43 : f32 to vector<8x32xf32>
    %111 = arith.subf %110, %104 : vector<8x32xf32>
    %112 = arith.mulf %111, %109 : vector<8x32xf32>
    %113 = arith.mulf %104, %86 : vector<8x32xf32>
    %114 = arith.addf %112, %113 : vector<8x32xf32>
    %115 = arith.truncf %114 : vector<8x32xf32> to vector<8x32xbf16>
    %cst_44 = arith.constant dense<0.000000e+00> : vector<8x32xf32>
    %116 = tpu.matmul %115, %53, %cst_44 {dimension_numbers = #tpu.dot_dimension_numbers<[1], [0], [0], [1], [0, 0, 1, 1], [], []>} : vector<8x32xbf16>, vector<32x32xbf16>, vector<8x32xf32> -> vector<8x32xf32>
    %cst_45 = arith.constant dense<0.000000e+00> : vector<8x32xf32>
    %117 = tpu.matmul %115, %54, %cst_45 {dimension_numbers = #tpu.dot_dimension_numbers<[1], [0], [0], [1], [0, 0, 1, 1], [], []>} : vector<8x32xbf16>, vector<32x32xbf16>, vector<8x32xf32> -> vector<8x32xf32>
    %cst_46 = arith.constant dense<0.000000e+00> : vector<8x32xf32>
    %118 = tpu.matmul %115, %55, %cst_46 {dimension_numbers = #tpu.dot_dimension_numbers<[1], [0], [0], [1], [0, 0, 1, 1], [], []>} : vector<8x32xbf16>, vector<32x32xbf16>, vector<8x32xf32> -> vector<8x32xf32>
    %119 = vector.extract_strided_slice %50 {offsets = [16, 0], sizes = [8, 32], strides = [1, 1]} : vector<48x32xf32> to vector<8x32xf32>
    %120 = arith.addf %119, %116 : vector<8x32xf32>
    %121 = arith.negf %120 : vector<8x32xf32>
    %122 = math.exp %121 : vector<8x32xf32>
    %cst_47 = arith.constant 1.000000e+00 : f32
    %123 = vector.broadcast %cst_47 : f32 to vector<8x32xf32>
    %124 = arith.addf %123, %122 : vector<8x32xf32>
    %125 = arith.divf %123, %124 : vector<8x32xf32>
    %126 = vector.extract_strided_slice %51 {offsets = [16, 0], sizes = [8, 32], strides = [1, 1]} : vector<48x32xf32> to vector<8x32xf32>
    %127 = arith.addf %126, %117 : vector<8x32xf32>
    %128 = arith.negf %127 : vector<8x32xf32>
    %129 = math.exp %128 : vector<8x32xf32>
    %cst_48 = arith.constant 1.000000e+00 : f32
    %130 = vector.broadcast %cst_48 : f32 to vector<8x32xf32>
    %131 = arith.addf %130, %129 : vector<8x32xf32>
    %132 = arith.divf %130, %131 : vector<8x32xf32>
    %133 = vector.extract_strided_slice %52 {offsets = [16, 0], sizes = [8, 32], strides = [1, 1]} : vector<48x32xf32> to vector<8x32xf32>
    %134 = arith.addf %118, %58 : vector<8x32xf32>
    %135 = arith.mulf %125, %134 : vector<8x32xf32>
    %136 = arith.addf %133, %135 : vector<8x32xf32>
    %137 = math.tanh %136 : vector<8x32xf32>
    %cst_49 = arith.constant 1.000000e+00 : f32
    %138 = vector.broadcast %cst_49 : f32 to vector<8x32xf32>
    %139 = arith.subf %138, %132 : vector<8x32xf32>
    %140 = arith.mulf %139, %137 : vector<8x32xf32>
    %141 = arith.mulf %132, %114 : vector<8x32xf32>
    %142 = arith.addf %140, %141 : vector<8x32xf32>
    %143 = arith.truncf %142 : vector<8x32xf32> to vector<8x32xbf16>
    %cst_50 = arith.constant dense<0.000000e+00> : vector<8x32xf32>
    %144 = tpu.matmul %143, %53, %cst_50 {dimension_numbers = #tpu.dot_dimension_numbers<[1], [0], [0], [1], [0, 0, 1, 1], [], []>} : vector<8x32xbf16>, vector<32x32xbf16>, vector<8x32xf32> -> vector<8x32xf32>
    %cst_51 = arith.constant dense<0.000000e+00> : vector<8x32xf32>
    %145 = tpu.matmul %143, %54, %cst_51 {dimension_numbers = #tpu.dot_dimension_numbers<[1], [0], [0], [1], [0, 0, 1, 1], [], []>} : vector<8x32xbf16>, vector<32x32xbf16>, vector<8x32xf32> -> vector<8x32xf32>
    %cst_52 = arith.constant dense<0.000000e+00> : vector<8x32xf32>
    %146 = tpu.matmul %143, %55, %cst_52 {dimension_numbers = #tpu.dot_dimension_numbers<[1], [0], [0], [1], [0, 0, 1, 1], [], []>} : vector<8x32xbf16>, vector<32x32xbf16>, vector<8x32xf32> -> vector<8x32xf32>
    %147 = vector.extract_strided_slice %50 {offsets = [24, 0], sizes = [8, 32], strides = [1, 1]} : vector<48x32xf32> to vector<8x32xf32>
    %148 = arith.addf %147, %144 : vector<8x32xf32>
    %149 = arith.negf %148 : vector<8x32xf32>
    %150 = math.exp %149 : vector<8x32xf32>
    %cst_53 = arith.constant 1.000000e+00 : f32
    %151 = vector.broadcast %cst_53 : f32 to vector<8x32xf32>
    %152 = arith.addf %151, %150 : vector<8x32xf32>
    %153 = arith.divf %151, %152 : vector<8x32xf32>
    %154 = vector.extract_strided_slice %51 {offsets = [24, 0], sizes = [8, 32], strides = [1, 1]} : vector<48x32xf32> to vector<8x32xf32>
    %155 = arith.addf %154, %145 : vector<8x32xf32>
    %156 = arith.negf %155 : vector<8x32xf32>
    %157 = math.exp %156 : vector<8x32xf32>
    %cst_54 = arith.constant 1.000000e+00 : f32
    %158 = vector.broadcast %cst_54 : f32 to vector<8x32xf32>
    %159 = arith.addf %158, %157 : vector<8x32xf32>
    %160 = arith.divf %158, %159 : vector<8x32xf32>
    %161 = vector.extract_strided_slice %52 {offsets = [24, 0], sizes = [8, 32], strides = [1, 1]} : vector<48x32xf32> to vector<8x32xf32>
    %162 = arith.addf %146, %58 : vector<8x32xf32>
    %163 = arith.mulf %153, %162 : vector<8x32xf32>
    %164 = arith.addf %161, %163 : vector<8x32xf32>
    %165 = math.tanh %164 : vector<8x32xf32>
    %cst_55 = arith.constant 1.000000e+00 : f32
    %166 = vector.broadcast %cst_55 : f32 to vector<8x32xf32>
    %167 = arith.subf %166, %160 : vector<8x32xf32>
    %168 = arith.mulf %167, %165 : vector<8x32xf32>
    %169 = arith.mulf %160, %142 : vector<8x32xf32>
    %170 = arith.addf %168, %169 : vector<8x32xf32>
    %171 = arith.truncf %170 : vector<8x32xf32> to vector<8x32xbf16>
    %cst_56 = arith.constant dense<0.000000e+00> : vector<8x32xf32>
    %172 = tpu.matmul %171, %53, %cst_56 {dimension_numbers = #tpu.dot_dimension_numbers<[1], [0], [0], [1], [0, 0, 1, 1], [], []>} : vector<8x32xbf16>, vector<32x32xbf16>, vector<8x32xf32> -> vector<8x32xf32>
    %cst_57 = arith.constant dense<0.000000e+00> : vector<8x32xf32>
    %173 = tpu.matmul %171, %54, %cst_57 {dimension_numbers = #tpu.dot_dimension_numbers<[1], [0], [0], [1], [0, 0, 1, 1], [], []>} : vector<8x32xbf16>, vector<32x32xbf16>, vector<8x32xf32> -> vector<8x32xf32>
    %cst_58 = arith.constant dense<0.000000e+00> : vector<8x32xf32>
    %174 = tpu.matmul %171, %55, %cst_58 {dimension_numbers = #tpu.dot_dimension_numbers<[1], [0], [0], [1], [0, 0, 1, 1], [], []>} : vector<8x32xbf16>, vector<32x32xbf16>, vector<8x32xf32> -> vector<8x32xf32>
    %175 = vector.extract_strided_slice %50 {offsets = [32, 0], sizes = [8, 32], strides = [1, 1]} : vector<48x32xf32> to vector<8x32xf32>
    %176 = arith.addf %175, %172 : vector<8x32xf32>
    %177 = arith.negf %176 : vector<8x32xf32>
    %178 = math.exp %177 : vector<8x32xf32>
    %cst_59 = arith.constant 1.000000e+00 : f32
    %179 = vector.broadcast %cst_59 : f32 to vector<8x32xf32>
    %180 = arith.addf %179, %178 : vector<8x32xf32>
    %181 = arith.divf %179, %180 : vector<8x32xf32>
    %182 = vector.extract_strided_slice %51 {offsets = [32, 0], sizes = [8, 32], strides = [1, 1]} : vector<48x32xf32> to vector<8x32xf32>
    %183 = arith.addf %182, %173 : vector<8x32xf32>
    %184 = arith.negf %183 : vector<8x32xf32>
    %185 = math.exp %184 : vector<8x32xf32>
    %cst_60 = arith.constant 1.000000e+00 : f32
    %186 = vector.broadcast %cst_60 : f32 to vector<8x32xf32>
    %187 = arith.addf %186, %185 : vector<8x32xf32>
    %188 = arith.divf %186, %187 : vector<8x32xf32>
    %189 = vector.extract_strided_slice %52 {offsets = [32, 0], sizes = [8, 32], strides = [1, 1]} : vector<48x32xf32> to vector<8x32xf32>
    %190 = arith.addf %174, %58 : vector<8x32xf32>
    %191 = arith.mulf %181, %190 : vector<8x32xf32>
    %192 = arith.addf %189, %191 : vector<8x32xf32>
    %193 = math.tanh %192 : vector<8x32xf32>
    %cst_61 = arith.constant 1.000000e+00 : f32
    %194 = vector.broadcast %cst_61 : f32 to vector<8x32xf32>
    %195 = arith.subf %194, %188 : vector<8x32xf32>
    %196 = arith.mulf %195, %193 : vector<8x32xf32>
    %197 = arith.mulf %188, %170 : vector<8x32xf32>
    %198 = arith.addf %196, %197 : vector<8x32xf32>
    %199 = arith.truncf %198 : vector<8x32xf32> to vector<8x32xbf16>
    %cst_62 = arith.constant dense<0.000000e+00> : vector<8x32xf32>
    %200 = tpu.matmul %199, %53, %cst_62 {dimension_numbers = #tpu.dot_dimension_numbers<[1], [0], [0], [1], [0, 0, 1, 1], [], []>} : vector<8x32xbf16>, vector<32x32xbf16>, vector<8x32xf32> -> vector<8x32xf32>
    %cst_63 = arith.constant dense<0.000000e+00> : vector<8x32xf32>
    %201 = tpu.matmul %199, %54, %cst_63 {dimension_numbers = #tpu.dot_dimension_numbers<[1], [0], [0], [1], [0, 0, 1, 1], [], []>} : vector<8x32xbf16>, vector<32x32xbf16>, vector<8x32xf32> -> vector<8x32xf32>
    %cst_64 = arith.constant dense<0.000000e+00> : vector<8x32xf32>
    %202 = tpu.matmul %199, %55, %cst_64 {dimension_numbers = #tpu.dot_dimension_numbers<[1], [0], [0], [1], [0, 0, 1, 1], [], []>} : vector<8x32xbf16>, vector<32x32xbf16>, vector<8x32xf32> -> vector<8x32xf32>
    %203 = vector.extract_strided_slice %50 {offsets = [40, 0], sizes = [8, 32], strides = [1, 1]} : vector<48x32xf32> to vector<8x32xf32>
    %204 = arith.addf %203, %200 : vector<8x32xf32>
    %205 = arith.negf %204 : vector<8x32xf32>
    %206 = math.exp %205 : vector<8x32xf32>
    %cst_65 = arith.constant 1.000000e+00 : f32
    %207 = vector.broadcast %cst_65 : f32 to vector<8x32xf32>
    %208 = arith.addf %207, %206 : vector<8x32xf32>
    %209 = arith.divf %207, %208 : vector<8x32xf32>
    %210 = vector.extract_strided_slice %51 {offsets = [40, 0], sizes = [8, 32], strides = [1, 1]} : vector<48x32xf32> to vector<8x32xf32>
    %211 = arith.addf %210, %201 : vector<8x32xf32>
    %212 = arith.negf %211 : vector<8x32xf32>
    %213 = math.exp %212 : vector<8x32xf32>
    %cst_66 = arith.constant 1.000000e+00 : f32
    %214 = vector.broadcast %cst_66 : f32 to vector<8x32xf32>
    %215 = arith.addf %214, %213 : vector<8x32xf32>
    %216 = arith.divf %214, %215 : vector<8x32xf32>
    %217 = vector.extract_strided_slice %52 {offsets = [40, 0], sizes = [8, 32], strides = [1, 1]} : vector<48x32xf32> to vector<8x32xf32>
    %218 = arith.addf %202, %58 : vector<8x32xf32>
    %219 = arith.mulf %209, %218 : vector<8x32xf32>
    %220 = arith.addf %217, %219 : vector<8x32xf32>
    %221 = math.tanh %220 : vector<8x32xf32>
    %cst_67 = arith.constant 1.000000e+00 : f32
    %222 = vector.broadcast %cst_67 : f32 to vector<8x32xf32>
    %223 = arith.subf %222, %216 : vector<8x32xf32>
    %224 = arith.mulf %223, %221 : vector<8x32xf32>
    %225 = arith.mulf %216, %198 : vector<8x32xf32>
    %226 = arith.addf %224, %225 : vector<8x32xf32>
    %227 = tpu.concatenate %86, %114, %142, %170, %198, %226 in 0 : vector<8x32xf32>, vector<8x32xf32>, vector<8x32xf32>, vector<8x32xf32>, vector<8x32xf32>, vector<8x32xf32> -> vector<48x32xf32>
    %c272 = arith.constant 272 : index
    %c0_68 = arith.constant 0 : index
    %228 = vector.load %arg2[%c272, %c0_68] : memref<416x128xbf16, #tpu.memory_space<vmem>>, vector<32x32xbf16>
    %229 = arith.truncf %227 : vector<48x32xf32> to vector<48x32xbf16>
    %cst_69 = arith.constant dense<0.000000e+00> : vector<48x32xf32>
    %230 = tpu.matmul %229, %228, %cst_69 {dimension_numbers = #tpu.dot_dimension_numbers<[1], [0], [0], [1], [0, 0, 1, 1], [], []>} : vector<48x32xbf16>, vector<32x32xbf16>, vector<48x32xf32> -> vector<48x32xf32>
    %c0_70 = arith.constant 0 : index
    %c1024 = arith.constant 1024 : index
    %231 = vector.load %arg3[%c0_70, %c1024] : memref<1x1536xf32, #tpu.memory_space<vmem>>, vector<1x32xf32>
    %232 = vector.broadcast %231 : vector<1x32xf32> to vector<48x32xf32>
    %233 = arith.addf %230, %232 : vector<48x32xf32>
    %cst_71 = arith.constant 0.000000e+00 : f32
    %234 = vector.broadcast %cst_71 : f32 to vector<48x32xf32>
    %235 = arith.maximumf %233, %234 : vector<48x32xf32>
    %c304 = arith.constant 304 : index
    %c0_72 = arith.constant 0 : index
    %236 = vector.load %arg2[%c304, %c0_72] : memref<416x128xbf16, #tpu.memory_space<vmem>>, vector<32x16xbf16>
    %237 = arith.truncf %235 : vector<48x32xf32> to vector<48x32xbf16>
    %cst_73 = arith.constant dense<0.000000e+00> : vector<48x16xf32>
    %238 = tpu.matmul %237, %236, %cst_73 {dimension_numbers = #tpu.dot_dimension_numbers<[1], [0], [0], [1], [0, 0, 1, 1], [], []>} : vector<48x32xbf16>, vector<32x16xbf16>, vector<48x16xf32> -> vector<48x16xf32>
    %c0_74 = arith.constant 0 : index
    %c1152 = arith.constant 1152 : index
    %239 = vector.load %arg3[%c0_74, %c1152] : memref<1x1536xf32, #tpu.memory_space<vmem>>, vector<1x16xf32>
    %240 = vector.broadcast %239 : vector<1x16xf32> to vector<48x16xf32>
    %241 = arith.addf %238, %240 : vector<48x16xf32>
    %c336 = arith.constant 336 : index
    %c0_75 = arith.constant 0 : index
    %242 = vector.load %arg2[%c336, %c0_75] : memref<416x128xbf16, #tpu.memory_space<vmem>>, vector<16x32xbf16>
    %243 = arith.truncf %241 : vector<48x16xf32> to vector<48x16xbf16>
    %cst_76 = arith.constant dense<0.000000e+00> : vector<48x32xf32>
    %244 = tpu.matmul %243, %242, %cst_76 {dimension_numbers = #tpu.dot_dimension_numbers<[1], [0], [0], [1], [0, 0, 1, 1], [], []>} : vector<48x16xbf16>, vector<16x32xbf16>, vector<48x32xf32> -> vector<48x32xf32>
    %c352 = arith.constant 352 : index
    %c0_77 = arith.constant 0 : index
    %245 = vector.load %arg2[%c352, %c0_77] : memref<416x128xbf16, #tpu.memory_space<vmem>>, vector<32x32xbf16>
    %246 = arith.truncf %43 : vector<48x32xf32> to vector<48x32xbf16>
    %cst_78 = arith.constant dense<0.000000e+00> : vector<48x32xf32>
    %247 = tpu.matmul %246, %245, %cst_78 {dimension_numbers = #tpu.dot_dimension_numbers<[1], [0], [0], [1], [0, 0, 1, 1], [], []>} : vector<48x32xbf16>, vector<32x32xbf16>, vector<48x32xf32> -> vector<48x32xf32>
    %248 = arith.addf %244, %247 : vector<48x32xf32>
    %c0_79 = arith.constant 0 : index
    %c1280 = arith.constant 1280 : index
    %249 = vector.load %arg3[%c0_79, %c1280] : memref<1x1536xf32, #tpu.memory_space<vmem>>, vector<1x32xf32>
    %250 = vector.broadcast %249 : vector<1x32xf32> to vector<48x32xf32>
    %251 = arith.addf %248, %250 : vector<48x32xf32>
    %cst_80 = arith.constant 0.000000e+00 : f32
    %252 = vector.broadcast %cst_80 : f32 to vector<48x32xf32>
    %253 = arith.maximumf %251, %252 : vector<48x32xf32>
    %c384_81 = arith.constant 384 : index
    %c0_82 = arith.constant 0 : index
    %254 = vector.load %arg2[%c384_81, %c0_82] : memref<416x128xbf16, #tpu.memory_space<vmem>>, vector<32x128xbf16>
    %255 = arith.truncf %253 : vector<48x32xf32> to vector<48x32xbf16>
    %cst_83 = arith.constant dense<0.000000e+00> : vector<48x128xf32>
    %256 = tpu.matmul %255, %254, %cst_83 {dimension_numbers = #tpu.dot_dimension_numbers<[1], [0], [0], [1], [0, 0, 1, 1], [], []>} : vector<48x32xbf16>, vector<32x128xbf16>, vector<48x128xf32> -> vector<48x128xf32>
    %c0_84 = arith.constant 0 : index
    %c1408 = arith.constant 1408 : index
    %257 = vector.load %arg3[%c0_84, %c1408] : memref<1x1536xf32, #tpu.memory_space<vmem>>, vector<1x128xf32>
    %258 = vector.broadcast %257 : vector<1x128xf32> to vector<48x128xf32>
    %259 = arith.addf %256, %258 : vector<48x128xf32>
    %c0_85 = arith.constant 0 : index
    %c0_86 = arith.constant 0 : index
    %260 = vector.load %arg4[%c0_85, %c0_86] : memref<56x384xf32, #tpu.memory_space<vmem>>, vector<8x16xf32>
    tpu.vector_store %arg4[%c0_85, %c0_86], %14 {strides = array<i32>} : memref<56x384xf32, #tpu.memory_space<vmem>>, vector<8x16xf32>,
    %c8 = arith.constant 8 : index
    %c0_87 = arith.constant 0 : index
    %261 = vector.load %arg4[%c8, %c0_87] : memref<56x384xf32, #tpu.memory_space<vmem>>, vector<48x16xf32>
    tpu.vector_store %arg4[%c8, %c0_87], %241 {strides = array<i32>} : memref<56x384xf32, #tpu.memory_space<vmem>>, vector<48x16xf32>,
    %c8_88 = arith.constant 8 : index
    %c128_89 = arith.constant 128 : index
    %262 = vector.load %arg4[%c8_88, %c128_89] : memref<56x384xf32, #tpu.memory_space<vmem>>, vector<48x32xf32>
    tpu.vector_store %arg4[%c8_88, %c128_89], %43 {strides = array<i32>} : memref<56x384xf32, #tpu.memory_space<vmem>>, vector<48x32xf32>,
    %c8_90 = arith.constant 8 : index
    %c256_91 = arith.constant 256 : index
    %263 = vector.load %arg4[%c8_90, %c256_91] : memref<56x384xf32, #tpu.memory_space<vmem>>, vector<48x128xf32>
    tpu.vector_store %arg4[%c8_90, %c256_91], %259 {strides = array<i32>} : memref<56x384xf32, #tpu.memory_space<vmem>>, vector<48x128xf32>,
    return
  }
}

</mosaic_0001>

<bundles_post_ra>
// kernel: tpu_custom_call.1
= control target key start
LH: loop header
LB: loop body
LE: loop exit
PB: predicated region body
PF: predicated region fallthrough
CT: control target
= control target key end

     0   :  { %9 = vsyncpa [#allocation3], 0  ;;  %s3196_s0 = inlined_call_operand.vmem [shape: f32[8,12], index: 0, kind: input, shape index: {}]   ;;  %s3197_s1 = inlined_call_operand.vmem [shape: f32[48,6], index: 1, kind: input, shape index: {}]   ;;  %s3198_s2 = inlined_call_operand.hbm [shape: bf16[416,128], index: 2, kind: input, shape index: {}]   ;;  %s3199_s3 = inlined_call_operand.vmem [shape: f32[1,1536], index: 3, kind: input, shape index: {}]   ;;  %s3200_s4 = inlined_call_operand.hbm [shape: f32[56,384], index: 4, kind: output, shape index: {}]  }
   0x1   :  { %10 = vsyncpa [#allocation4], 0  ;;  %s2720_s15 = smov [#allocation2]   ;;  %s2672_s19 = scalar_lea.hbm %s3198_s2, 3328 }
   0x2   :  { %s20_s16 = sshll.u32 %s2720_s15, 4  ;;  %p2673_p0 = scmp.ne.s32.totalorder %s3198_s2, %s2672_s19  ;;  %s21_s16 = int_to_ptr.vmem [resolvable:$true] %s20_s16 }
   0x3   :  { %p2676_p1 = scmp.lt.u32.totalorder %s2672_s19, %s3198_s2 }
   0x5   :  { %p2678_p2 = pnand %p2676_p1, %p2673_p0 }
   0x7   :  { %2681 = shalt.err (!%p2678_p2)
}
   0x8   :  { %s2682_s24 = scalar_lea.vmem %s21_s16, 3328  ;;  %p2687_p4 = scmp.lt.s32.totalorder %s21_s16, %s21_s16 }
   0x9   :  { %p2683_p3 = scmp.ne.s32.totalorder %s21_s16, %s2682_s24  ;;  %p2688_p5 = scmp.lt.s32.totalorder %s2682_s24, %s2682_s24 }
   0xb   :  { %p2689_p6 = por %p2688_p5, %p2687_p4 }
   0xd   :  { %p2690_p7 = pnand %p2689_p6, %p2683_p3 }
   0xf   :  { %2693 = shalt.err (!%p2690_p7)
}
  0x10   :  { %s2721_s25 = smov 64   ;;  %s2722_s26 = smov 4  }
  0x11   :  { %26 = dma.hbm_to_vmem [thread:$0]  %s3198_s2, 3328, %s21_s16, [#allocation3], %s2721_s25, %s2721_s25, %s2722_s26  }
  0x12   :  { %2716 = dma.done.wait [#allocation3], 3328  }
  0x13   :  { %2717 = vsyncadd [#allocation3], 4294963968  ;;  %v2723_v0 = vmov 0.0   ;;  %vm2724_vm0 = vmmov 0   ;;  %vm53_vm1 = vcmask 1045504   ;;  %v33_v2 = vld [vmem:[%s3196_s0] sm:$0xff] }
  0x14   :  { %2281 = vmatprep.subr.bf16.mxu0 %v2723_v0  ;;  %2283 = vmatprep.mubr.msk.bf16.mxu0 %vm2724_vm0, %v2723_v0  ;;  %v2587_v1 = vld [vmem:[#allocation2] sm:$0x3f]   ;;  %v36_v4 = vpack.c.bf16 %v33_v2, %v33_v2  ;;  %vm49_vm2 = vcmask 97280   ;;  %v2588_v5 = vld [vmem:[#allocation2 + $0x8] sm:$0xff]   ;;  %v2589_v6 = vld [vmem:[#allocation2 + $0x10] sm:$0xff]   ;;  %vm122_vm3 = vcmask 261120  }
  0x15   :  { %2301 = vmatprep.subr.bf16.mxu1 %v2723_v0  ;;  %2305 = vmatprep.mubr.msk.bf16.mxu1 %vm2724_vm0, %v2723_v0  ;;  %v55_v3 = vsel %vm53_vm1, %v2587_v1, 0  ;;  %v2084_v7 = vld [vmem:[%s3199_s3] ss:$0 sm:$0xff]  ;;  %v2590_v14 = vld [vmem:[#allocation2 + $0x18] sm:$0xff]   ;;  %v2087_v16 = vld [vmem:[%s3199_s3 + $0x1] ss:$0 sm:$0xff] }
  0x16   :  { %2282 = vmatpush3.bf16.msra.mxu0 %v55_v3  ;;  %vm182_vm4 = vcmask 130048   ;;  %v300_v18 = vld [vmem:[#allocation2 + $0x30] sm:$0x7]  ;;  %vm321_vm5 = vcmask 1042432   ;;  %v294_v25 = vld [vmem:[%s3197_s1] sm:$0xff]  ;;  %v295_v26 = vld [vmem:[%s3197_s1 + $0x8] sm:$0xff] }
  0x17   :  { %2287 = vmatprep.subr.bf16.mxu0 %v2723_v0  ;;  %v323_v24 = vsel %vm321_vm5, %v300_v18, 0  ;;  %v301_v27 = vpack.c.bf16 %v295_v26, %v294_v25  ;;  %vm311_vm6 = vcmask 48128   ;;  %v296_v28 = vld [vmem:[%s3197_s1 + $0x10] sm:$0xff]  ;;  %v297_v29 = vld [vmem:[%s3197_s1 + $0x18] sm:$0xff]  ;;  %v298_v31 = vld [vmem:[%s3197_s1 + $0x20] sm:$0xff]  ;;  %s2725_s2 = smov 32  }
  0x18   :  { %v302_v30 = vpack.c.bf16 %v297_v29, %v296_v28  ;;  %v299_v32 = vld [vmem:[%s3197_s1 + $0x28] sm:$0xff]  ;;  %v2591_v34 = vld [vmem:[#allocation2 + $0x20] sm:$0xff]   ;;  %v2593_v44 = vld [vmem:[#allocation2 + $0x38] sm:$0xff]   ;;  %s2726_s0 = smov 96   ;;  %s2727_s12 = smov [#allocation5]  }
  0x19   :  { %2284 = vmatmul.mubr.msk.bf16.vlgmr.msra.gmra.mrb[0].mxu0 %vm49_vm2, %v36_v4  ;;  %v303_v33 = vpack.c.bf16 %v299_v32, %v298_v31  ;;  %2302 = vmatpush3.bf16.msra.mxu1 %v2591_v34  ;;  %v2592_v35 = vld [vmem:[#allocation2 + $0x28] sm:$0xff]   ;;  %v2091_v37 = vld [vmem:[%s3199_s3 + $0x2] ss:$0 sm:$0xff]  ;;  %v2098_v46 = vld [vmem:[%s3199_s3 + $0x4] ss:$0 sm:$0xff] }
  0x1a   :  { %2288 = vmatpush3.bf16.msra.mxu0 %v2588_v5  ;;  %2291 = vmatprep.mubr.msk.bf16.mxu0 %vm2724_vm0, %v2723_v0  ;;  %v2595_v36 = vld [vmem:[#allocation2 + $0x48] sm:$0xff]   ;;  %v2594_v48 = vld [vmem:[#allocation2 + $0x40] sm:$0xff]   ;;  %v2836_v56 = vld [vmem:[#allocation2 + $0x58] sm:$0xff]  }
  0x1b   :  { %2289 = vmatprep.subr.bf16.mxu0 %v2723_v0  ;;  %2303 = vmatprep.subr.bf16.mxu1 %v2723_v0  ;;  %v2874_v26 = vld [vmem:[#allocation2 + $0x78] sm:$0xff]   ;;  %v2880_v32 = vld [vmem:[#allocation2 + $0x80] sm:$0xff]  }
  0x1d   :  { %2304 = vmatpush3.bf16.msra.mxu1 %v2592_v35 }
  0x1e   :  { %2290 = vmatpush3.bf16.msra.mxu0 %v2589_v6  ;;  %2323 = vmatprep.subr.bf16.mxu1 %v2723_v0 }
  0x1f   :  { %2295 = vmatprep.subr.bf16.mxu0 %v2723_v0 }
  0xec   :  { %v91_v8 = vpop.f32.mrb[0].mxu0 }
  0xed   :  { %v92_v9 = vadd.f32 %v2084_v7, %v91_v8  ;;  %v2285_v10 = vpop.f32.mrb[1].mxu0 }
  0xee   :  { %v94_v11 = vpop.f32.mrb[2].mxu0 }
  0xef   :  { %v97_v12 = vmax.f32 %v92_v9, 0.0  ;;  %v2286_v13 = vpop.f32.mrb[3].mxu0 }
  0xf0   :  { %v2849_v13 = vld [vmem:[#allocation2 + $0x60] sm:$0xff]  }
  0xf1   :  { %v102_v15 = vpack.c.bf16 %v97_v12, %v97_v12 }
  0xf3   :  { %2292 = vmatmul.mubr.msk.bf16.vlgmr.msra.gmra.mrb[4].mxu0 %vm122_vm3, %v102_v15  ;;  %v2094_v15 = vld [vmem:[%s3199_s3 + $0x3] ss:$0 sm:$0xff] }
  0xf4   :  { %2296 = vmatpush3.bf16.msra.mxu0 %v2590_v14  ;;  %2297 = vmatprep.mubr.msk.bf16.mxu0 %vm2724_vm0, %v2723_v0  ;;  %v2598_v14 = vld [vmem:[#allocation2 + $0x50] sm:$0xff]  }
  0xf5   :  { %2309 = vmatprep.subr.bf16.mxu0 %v2723_v0 }
 0x1c6   :  { %v160_v17 = vpop.f32.mrb[4].mxu0 }
 0x1c7   :  { %v161_v19 = vadd.f32 %v2087_v16, %v160_v17  ;;  %v2293_v20 = vpop.f32.mrb[5].mxu0 }
 0x1c8   :  { %v163_v21 = vpop.f32.mrb[6].mxu0  ;;  %v2859_v20 = vld [vmem:[#allocation2 + $0x68] sm:$0xff]  }
 0x1c9   :  { %v168_v22 = vpack.c.bf16 %v161_v19, %v161_v19  ;;  %2048 = vst.msk [vmem:[#allocation5] sm:$0xff] %vm182_vm4, %v161_v19  ;;  %v2294_v23 = vpop.f32.mrb[7].mxu0 }
 0x1ca   :  { %v2865_v23 = vld [vmem:[#allocation2 + $0x70] sm:$0xff]  }
 0x1cb   :  { %2298 = vmatmul.mubr.msk.bf16.vlgmr.msra.gmra.mrb[8].mxu0 %vm182_vm4, %v168_v22 }
 0x1cc   :  { %2310 = vmatpush3.bf16.msra.mxu0 %v323_v24  ;;  %2311 = vmatprep.mubr.msk.bf16.mxu0 %vm2724_vm0, %v2723_v0  ;;  %v2102_v24 = vld [vmem:[%s3199_s3 + $0x5] ss:$0 sm:$0xff] }
 0x1cd   :  { %2339 = vmatprep.subr.bf16.mxu0 %v2723_v0 }
 0x1d3   :  { %2312 = vmatmul.mubr.msk.bf16.vlgmr.msra.gmra.mrb[12].mxu0 %vm311_vm6, %v301_v27 }
 0x1d4   :  { %2315 = vmatprep.mubr.msk.bf16.mxu0 %vm2724_vm0, %v2723_v0  ;;  %2340 = vmatpush3.bf16.msra.mxu0 %v2595_v36 }
 0x1d5   :  { %2341 = vmatprep.subr.bf16.mxu0 %v2723_v0 }
 0x1d8   :  { %2342 = vmatpush3.bf16.msra.mxu0 %v2598_v14 }
 0x1d9   :  { %2379 = vmatprep.subr.bf16.mxu0 %v2723_v0 }
 0x1db   :  { %2316 = vmatmul.mubr.msk.bf16.gmra.mrb[16].mxu0 %vm311_vm6, %v302_v30 }
 0x1dc   :  { %2319 = vmatprep.mubr.msk.bf16.mxu0 %vm2724_vm0, %v2723_v0 }
 0x1e3   :  { %2320 = vmatmul.mubr.msk.bf16.gmra.mrb[20].mxu0 %vm311_vm6, %v303_v33 }
 0x1e4   :  { %2343 = vmatprep.mubr.msk.bf16.mxu0 %vm2724_vm0, %v2723_v0 }
 0x29e   :  { %v220_v38 = vpop.f32.mrb[8].mxu0 }
 0x29f   :  { %v221_v39 = vadd.f32 %v2091_v37, %v220_v38  ;;  %v2299_v40 = vpop.f32.mrb[9].mxu0 }
 0x2a0   :  { %v223_v41 = vpop.f32.mrb[10].mxu0 }
 0x2a1   :  { %v226_v42 = vmax.f32 %v221_v39, 0.0  ;;  %v2300_v43 = vpop.f32.mrb[11].mxu0 }
 0x2a3   :  { %v231_v45 = vpack.c.bf16 %v226_v42, %v226_v42 }
 0x2a5   :  { %2306 = vmatmul.mubr.msk.bf16.vlgmr.msra.gmra.mrb[0].mxu1 %vm122_vm3, %v231_v45 }
 0x2a6   :  { %v359_v47 = vpop.f32.mrb[12].mxu0  ;;  %2324 = vmatpush3.bf16.msra.mxu1 %v2593_v44  ;;  %2327 = vmatprep.mubr.msk.bf16.mxu1 %vm2724_vm0, %v2723_v0 }
 0x2a7   :  { %v360_v49 = vadd.f32 %v2098_v46, %v359_v47  ;;  %v2313_v50 = vpop.f32.mrb[13].mxu0  ;;  %2325 = vmatprep.subr.bf16.mxu1 %v2723_v0 }
 0x2a8   :  { %v362_v51 = vpop.f32.mrb[14].mxu0 }
 0x2a9   :  { %v363_v52 = vadd.f32 %v2098_v46, %v362_v51  ;;  %v2314_v53 = vpop.f32.mrb[15].mxu0  ;;  %v382_v54 = vmax.f32 %v360_v49, 0.0 }
 0x2aa   :  { %2326 = vmatpush3.bf16.msra.mxu1 %v2594_v48 }
 0x2ab   :  { %v383_v55 = vmax.f32 %v363_v52, 0.0  ;;  %2355 = vmatprep.subr.bf16.mxu1 %v2723_v0 }
 0x2ad   :  { %v392_v57 = vpack.c.bf16 %v383_v55, %v382_v54  ;;  %v2108_v55 = vld [vmem:[%s3199_s3 + $0x6] ss:$0 sm:$0xff] }
 0x2ae   :  { %v367_v58 = vpop.f32.mrb[16].mxu0 }
 0x2af   :  { %2328 = vmatmul.mubr.msk.bf16.vlgmr.msra.gmra.mrb[4].mxu1 %vm122_vm3, %v392_v57  ;;  %v368_v59 = vadd.f32 %v2098_v46, %v367_v58  ;;  %v2317_v60 = vpop.f32.mrb[17].mxu0 }
 0x2b0   :  { %v370_v61 = vpop.f32.mrb[18].mxu0  ;;  %2331 = vmatprep.mubr.msk.bf16.mxu1 %vm2724_vm0, %v2723_v0  ;;  %2356 = vmatpush3.bf16.msra.mxu1 %v2836_v56 }
 0x2b1   :  { %v384_v62 = vmax.f32 %v368_v59, 0.0  ;;  %v371_v63 = vadd.f32 %v2098_v46, %v370_v61  ;;  %v2318_v1 = vpop.f32.mrb[19].mxu0  ;;  %2357 = vmatprep.subr.bf16.mxu1 %v2723_v0 }
 0x2b3   :  { %v385_v2 = vmax.f32 %v371_v63, 0.0 }
 0x2b4   :  { %2358 = vmatpush3.bf16.msra.mxu1 %v2849_v13 }
 0x2b5   :  { %v393_v3 = vpack.c.bf16 %v385_v2, %v384_v62  ;;  %2363 = vmatprep.subr.bf16.mxu1 %v2723_v0 }
 0x2b6   :  { %v375_v4 = vpop.f32.mrb[20].mxu0 }
 0x2b7   :  { %v376_v5 = vadd.f32 %v2098_v46, %v375_v4  ;;  %v2321_v6 = vpop.f32.mrb[21].mxu0  ;;  %2332 = vmatmul.mubr.msk.bf16.gmra.mrb[8].mxu1 %vm122_vm3, %v393_v3 }
 0x2b8   :  { %v378_v7 = vpop.f32.mrb[22].mxu0  ;;  %2335 = vmatprep.mubr.msk.bf16.mxu1 %vm2724_vm0, %v2723_v0 }
 0x2b9   :  { %v386_v8 = vmax.f32 %v376_v5, 0.0  ;;  %v379_v9 = vadd.f32 %v2098_v46, %v378_v7  ;;  %v2322_v10 = vpop.f32.mrb[23].mxu0 }
 0x2bb   :  { %v387_v11 = vmax.f32 %v379_v9, 0.0  ;;  %v2929_v9 = vld [vmem:[%s3199_s3 + $0x7] ss:$0 sm:$0xff] }
 0x2bd   :  { %v394_v12 = vpack.c.bf16 %v387_v11, %v386_v8 }
 0x2bf   :  { %2336 = vmatmul.mubr.msk.bf16.gmra.mrb[12].mxu1 %vm122_vm3, %v394_v12 }
 0x2c0   :  { %2359 = vmatprep.mubr.msk.bf16.mxu1 %vm2724_vm0, %v2723_v0 }
 0x378   :  { %v288_v16 = vpop.f32.mrb[0].mxu1 }
 0x379   :  { %v2857_v17 = vadd.f32 %v2094_v15, %v288_v16  ;;  %v2307_v18 = vpop.f32.mrb[1].mxu1 }
 0x37a   :  { %v291_v19 = vpop.f32.mrb[2].mxu1 }
 0x37b   :  { %v591_v21 = vpack.c.bf16 %v2857_v17, %v2857_v17  ;;  %v2308_v22 = vpop.f32.mrb[3].mxu1 }
 0x37d   :  { %2360 = vmatmul.mubr.msk.bf16.vlgmr.msra.gmra.mrb[16].mxu1 %vm122_vm3, %v591_v21 }
 0x37e   :  { %2364 = vmatpush3.bf16.msra.mxu1 %v2859_v20  ;;  %2367 = vmatprep.mubr.msk.bf16.mxu1 %vm2724_vm0, %v2723_v0 }
 0x37f   :  { %2365 = vmatprep.subr.bf16.mxu1 %v2723_v0 }
 0x382   :  { %v457_v25 = vpop.f32.mrb[4].mxu1  ;;  %2366 = vmatpush3.bf16.msra.mxu1 %v2865_v23 }
 0x383   :  { %v458_v27 = vadd.f32 %v2102_v24, %v457_v25  ;;  %v2329_v28 = vpop.f32.mrb[5].mxu1  ;;  %2371 = vmatprep.subr.bf16.mxu1 %v2723_v0 }
 0x384   :  { %v460_v29 = vpop.f32.mrb[6].mxu1 }
 0x385   :  { %2055 = vst.msk [vmem:[#allocation5 + $0x20] sm:$0xff] %vm122_vm3, %v458_v27  ;;  %v461_v30 = vadd.f32 %v2102_v24, %v460_v29  ;;  %v2330_v31 = vpop.f32.mrb[7].mxu1  ;;  %2368 = vmatmul.mubr.msk.bf16.vlgmr.msra.gmra.mrb[20].mxu1 %vm122_vm3, %v591_v21 }
 0x386   :  { %2372 = vmatpush3.bf16.msra.mxu1 %v2874_v26  ;;  %2375 = vmatprep.mubr.msk.bf16.mxu1 %vm2724_vm0, %v2723_v0 }
 0x387   :  { %v2884_v33 = vpack.c.bf16 %v461_v30, %v458_v27  ;;  %2056 = vst.msk [vmem:[#allocation5 + $0x38] sm:$0xff] %vm122_vm3, %v461_v30  ;;  %2373 = vmatprep.subr.bf16.mxu1 %v2723_v0 }
 0x389   :  { %2344 = vmatmul.mubr.msk.bf16.vlgmr.msra.gmra.mrb[24].mxu0 %vm122_vm3, %v2884_v33 }
 0x38a   :  { %2374 = vmatpush3.bf16.msra.mxu1 %v2880_v32  ;;  %v465_v34 = vpop.f32.mrb[8].mxu1  ;;  %2347 = vmatprep.mubr.msk.bf16.mxu0 %vm2724_vm0, %v2723_v0 }
 0x38b   :  { %v466_v35 = vadd.f32 %v2102_v24, %v465_v34  ;;  %v2333_v36 = vpop.f32.mrb[9].mxu1  ;;  %2380 = vmatpush3.bf16.msra.mxu0 %v2836_v56  ;;  %2387 = vmatprep.subr.bf16.mxu1 %v2723_v0 }
 0x38c   :  { %v468_v37 = vpop.f32.mrb[10].mxu1  ;;  %2381 = vmatprep.subr.bf16.mxu0 %v2723_v0 }
 0x38d   :  { %2376 = vmatmul.mubr.msk.bf16.vlgmr.msra.gmra.mrb[24].mxu1 %vm122_vm3, %v591_v21  ;;  %2057 = vst.msk [vmem:[#allocation5 + $0x50] sm:$0xff] %vm122_vm3, %v466_v35  ;;  %v469_v38 = vadd.f32 %v2102_v24, %v468_v37  ;;  %v2334_v39 = vpop.f32.mrb[11].mxu1 }
 0x38e   :  { %2388 = vmatpush3.bf16.msra.mxu1 %v2859_v20  ;;  %2391 = vmatprep.mubr.msk.bf16.mxu1 %vm2724_vm0, %v2723_v0 }
 0x38f   :  { %v2901_v40 = vpack.c.bf16 %v469_v38, %v466_v35  ;;  %2058 = vst.msk [vmem:[#allocation5 + $0x68] sm:$0xff] %vm122_vm3, %v469_v38  ;;  %2382 = vmatpush3.bf16.msra.mxu0 %v2849_v13  ;;  %2389 = vmatprep.subr.bf16.mxu1 %v2723_v0 }
 0x390   :  { %2395 = vmatprep.subr.bf16.mxu0 %v2723_v0 }
 0x391   :  { %2348 = vmatmul.mubr.msk.bf16.gmra.mrb[28].mxu0 %vm122_vm3, %v2901_v40 }
 0x392   :  { %v473_v41 = vpop.f32.mrb[12].mxu1  ;;  %2351 = vmatprep.mubr.msk.bf16.mxu0 %vm2724_vm0, %v2723_v0  ;;  %2390 = vmatpush3.bf16.msra.mxu1 %v2865_v23 }
 0x393   :  { %v474_v42 = vadd.f32 %v2102_v24, %v473_v41  ;;  %v2337_v43 = vpop.f32.mrb[13].mxu1  ;;  %2403 = vmatprep.subr.bf16.mxu1 %v2723_v0 }
 0x394   :  { %v476_v44 = vpop.f32.mrb[14].mxu1 }
 0x395   :  { %2059 = vst.msk [vmem:[#allocation5 + $0x80] sm:$0xff] %vm122_vm3, %v474_v42  ;;  %v477_v45 = vadd.f32 %v2102_v24, %v476_v44  ;;  %v2338_v46 = vpop.f32.mrb[15].mxu1 }
 0x397   :  { %v2914_v47 = vpack.c.bf16 %v477_v45, %v474_v42  ;;  %2060 = vst.msk [vmem:[#allocation5 + $0x98] sm:$0xff] %vm122_vm3, %v477_v45 }
 0x399   :  { %2352 = vmatmul.mubr.msk.bf16.gmra.mrb[32].mxu0 %vm122_vm3, %v2914_v47 }
 0x39a   :  { %2383 = vmatprep.mubr.msk.bf16.mxu0 %vm2724_vm0, %v2723_v0 }
 0x450   :  { %v641_v48 = vpop.f32.mrb[16].mxu1 }
 0x451   :  { %v2361_v49 = vpop.f32.mrb[17].mxu1 }
 0x452   :  { %v644_v50 = vpop.f32.mrb[18].mxu1 }
 0x453   :  { %v2362_v51 = vpop.f32.mrb[19].mxu1 }
 0x458   :  { %v693_v52 = vpop.f32.mrb[20].mxu1 }
 0x459   :  { %v2369_v53 = vpop.f32.mrb[21].mxu1 }
 0x45a   :  { %v696_v54 = vpop.f32.mrb[22].mxu1 }
 0x45b   :  { %v2370_v57 = vpop.f32.mrb[23].mxu1 }
 0x45c   :  { %v549_v58 = vpop.f32.mrb[24].mxu0 }
 0x45d   :  { %v550_v59 = vadd.f32 %v2108_v55, %v549_v58  ;;  %v2345_v60 = vpop.f32.mrb[25].mxu0 }
 0x45e   :  { %v552_v61 = vpop.f32.mrb[26].mxu0 }
 0x45f   :  { %v699_v62 = vadd.f32 %v641_v48, %v550_v59  ;;  %v2924_v63 = vadd.f32 %v2108_v55, %v552_v61  ;;  %v2346_v1 = vpop.f32.mrb[27].mxu0 }
 0x460   :  { %v763_v2 = vpop.f32.mrb[24].mxu1 }
 0x461   :  { %v2121_v3 = vmul.f32 -1.442695, %v699_v62  ;;  %v2377_v4 = vpop.f32.mrb[25].mxu1  ;;  %v764_v10 = vadd.f32 %v2929_v9, %v763_v2 }
 0x462   :  { %v766_v5 = vpop.f32.mrb[26].mxu1 }
 0x463   :  { %2612 = vpow2.f32 %v2121_v3  ;;  %v2378_v6 = vpop.f32.mrb[27].mxu1 }
 0x464   :  { %v557_v14 = vpop.f32.mrb[28].mxu0 }
 0x465   :  { %v2934_v15 = vadd.f32 %v2108_v55, %v557_v14  ;;  %v2349_v16 = vpop.f32.mrb[29].mxu0 }
 0x466   :  { %v560_v18 = vpop.f32.mrb[30].mxu0 }
 0x467   :  { %v2936_v19 = vadd.f32 %v2108_v55, %v560_v18  ;;  %v2350_v21 = vpop.f32.mrb[31].mxu0 }
 0x46c   :  { %v565_v22 = vpop.f32.mrb[32].mxu0 }
 0x46d   :  { %v2613_v7 = vpop.eup %2612  ;;  %v2938_v24 = vadd.f32 %v2108_v55, %v565_v22  ;;  %v2353_v25 = vpop.f32.mrb[33].mxu0 }
 0x46e   :  { %v703_v8 = vadd.f32 1.0, %v2613_v7  ;;  %v568_v27 = vpop.f32.mrb[34].mxu0 }
 0x46f   :  { %v2940_v28 = vadd.f32 %v2108_v55, %v568_v27  ;;  %v2354_v29 = vpop.f32.mrb[35].mxu0 }
 0x470   :  { %2614 = vrcp.f32 %v703_v8 }
 0x47a   :  { %v2615_v11 = vpop.eup %2614 }
 0x47b   :  { %v769_v12 = vmul.f32 %v2615_v11, %v764_v10 }
 0x47d   :  { %771 = vrot.lane.b32.xlu0 %v769_v12, %s2721_s25 }
 0x481   :  { %707 = vrot.lane.b32.xlu0 %v693_v52, %s2725_s2 }
 0x4ef   :  { %v772_v30 = vpop.permute.xlu0 %771 }
 0x4f0   :  { %v774_v31 = vadd.f32 %v772_v30, %v550_v59 }
 0x4f2   :  { %2616 = vtanh.f32 %v774_v31 }
 0x4f3   :  { %v708_v35 = vpop.permute.xlu0 %707 }
 0x4f4   :  { %v710_v36 = vadd.f32 %v708_v35, %v550_v59 }
 0x4f6   :  { %v2122_v37 = vmul.f32 -1.442695, %v710_v36 }
 0x4f8   :  { %2618 = vpow2.f32 %v2122_v37 }
 0x4fc   :  { %v2617_v34 = vpop.eup %2616 }
 0x4fd   :  { %778 = vrot.lane.b32.xlu1 %v2617_v34, %s2726_s0 }
 0x501   :  { %783 = vrot.lane.b32.xlu1 %v2857_v17, %s2725_s2 }
 0x502   :  { %v2619_v38 = vpop.eup %2618 }
 0x503   :  { %v714_v39 = vadd.f32 1.0, %v2619_v38 }
 0x505   :  { %2620 = vrcp.f32 %v714_v39 }
 0x50f   :  { %v2621_v41 = vpop.eup %2620 }
 0x510   :  { %v776_v43 = vsub.f32 1.0, %v2621_v41 }
 0x56f   :  { %v779_v42 = vpop.permute.xlu1 %778 }
 0x570   :  { %v781_v45 = vmul.f32 %v779_v42, %v776_v43 }
 0x573   :  { %v784_v44 = vpop.permute.xlu1 %783 }
 0x574   :  { %v786_v46 = vmul.f32 %v2621_v41, %v784_v44 }
 0x576   :  { %v2945_v48 = vadd.f32 %v786_v46, %v781_v45 }
 0x578   :  { %v788_v49 = vpack.c.bf16 %v2945_v48, %v2945_v48 }
 0x57a   :  { %790 = vrot.lane.b32.xlu0 %v788_v49, %s2726_s0 }
 0x5ec   :  { %v791_v17 = vpop.permute.xlu0 %790 }
 0x5ed   :  { %2384 = vmatmul.mubr.msk.bf16.vlgmr.msra.gmra.mrb[36].mxu0 %vm122_vm3, %v791_v17  ;;  %2392 = vmatmul.mubr.msk.bf16.vlgmr.msra.gmra.mrb[28].mxu1 %vm122_vm3, %v791_v17 }
 0x5ee   :  { %2396 = vmatpush3.bf16.msra.mxu0 %v2874_v26  ;;  %2399 = vmatprep.mubr.msk.bf16.mxu0 %vm2724_vm0, %v2723_v0 }
 0x5ef   :  { %2397 = vmatprep.subr.bf16.mxu0 %v2723_v0  ;;  %2404 = vmatpush3.bf16.msra.mxu1 %v2836_v56 }
 0x5f0   :  { %2405 = vmatprep.subr.bf16.mxu1 %v2723_v0  ;;  %2407 = vmatprep.mubr.msk.bf16.mxu1 %vm2724_vm0, %v2723_v0 }
 0x5f2   :  { %2398 = vmatpush3.bf16.msra.mxu0 %v2880_v32 }
 0x5f3   :  { %2411 = vmatprep.subr.bf16.mxu0 %v2723_v0  ;;  %2406 = vmatpush3.bf16.msra.mxu1 %v2849_v13 }
 0x5f4   :  { %2419 = vmatprep.subr.bf16.mxu1 %v2723_v0 }
 0x5f5   :  { %2400 = vmatmul.mubr.msk.bf16.vlgmr.msra.gmra.mrb[40].mxu0 %vm122_vm3, %v791_v17 }
 0x5f6   :  { %2412 = vmatpush3.bf16.msra.mxu0 %v2859_v20  ;;  %2415 = vmatprep.mubr.msk.bf16.mxu0 %vm2724_vm0, %v2723_v0 }
 0x5f7   :  { %2413 = vmatprep.subr.bf16.mxu0 %v2723_v0 }
 0x5fa   :  { %2414 = vmatpush3.bf16.msra.mxu0 %v2865_v23 }
 0x5fb   :  { %2427 = vmatprep.subr.bf16.mxu0 %v2723_v0 }
 0x6c0   :  { %v829_v50 = vpop.f32.mrb[36].mxu0  ;;  %v869_v51 = vpop.f32.mrb[28].mxu1 }
 0x6c1   :  { %v875_v52 = vadd.f32 %v829_v50, %v2924_v63  ;;  %883 = vrot.lane.b32.xlu0 %v869_v51, %s2725_s2  ;;  %v2385_v53 = vpop.f32.mrb[37].mxu0  ;;  %v2393_v54 = vpop.f32.mrb[29].mxu1 }
 0x6c2   :  { %v832_v55 = vpop.f32.mrb[38].mxu0  ;;  %v872_v57 = vpop.f32.mrb[30].mxu1 }
 0x6c3   :  { %v2128_v58 = vmul.f32 -1.442695, %v875_v52  ;;  %v2386_v59 = vpop.f32.mrb[39].mxu0  ;;  %v2394_v60 = vpop.f32.mrb[31].mxu1 }
 0x6c5   :  { %2622 = vpow2.f32 %v2128_v58 }
 0x6c8   :  { %v927_v61 = vpop.f32.mrb[40].mxu0 }
 0x6c9   :  { %v2401_v62 = vpop.f32.mrb[41].mxu0  ;;  %v928_v5 = vadd.f32 %v2929_v9, %v927_v61 }
 0x6ca   :  { %v930_v1 = vpop.f32.mrb[42].mxu0 }
 0x6cb   :  { %v2402_v2 = vpop.f32.mrb[43].mxu0 }
 0x6cf   :  { %v2623_v3 = vpop.eup %2622 }
 0x6d0   :  { %v879_v4 = vadd.f32 1.0, %v2623_v3 }
 0x6d2   :  { %2624 = vrcp.f32 %v879_v4 }
 0x6dc   :  { %v2625_v6 = vpop.eup %2624 }
 0x6dd   :  { %v933_v7 = vmul.f32 %v2625_v6, %v928_v5 }
 0x6df   :  { %935 = vrot.lane.b32.xlu1 %v933_v7, %s2721_s25 }
 0x733   :  { %v884_v12 = vpop.permute.xlu0 %883 }
 0x734   :  { %v886_v14 = vadd.f32 %v884_v12, %v2924_v63 }
 0x736   :  { %v2129_v16 = vmul.f32 -1.442695, %v886_v14 }
 0x751   :  { %v936_v8 = vpop.permute.xlu1 %935 }
 0x752   :  { %v938_v10 = vadd.f32 %v936_v8, %v2924_v63 }
 0x754   :  { %2626 = vtanh.f32 %v938_v10 }
 0x755   :  { %2628 = vpow2.f32 %v2129_v16 }
 0x75e   :  { %v2627_v11 = vpop.eup %2626 }
 0x75f   :  { %942 = vrot.lane.b32.xlu1 %v2627_v11, %s2726_s0  ;;  %v2629_v18 = vpop.eup %2628 }
 0x760   :  { %v890_v21 = vadd.f32 1.0, %v2629_v18 }
 0x762   :  { %2630 = vrcp.f32 %v890_v21 }
 0x76c   :  { %v2631_v22 = vpop.eup %2630 }
 0x76d   :  { %v940_v25 = vsub.f32 1.0, %v2631_v22  ;;  %v946_v29 = vmul.f32 %v2631_v22, %v2945_v48 }
 0x7d1   :  { %v943_v27 = vpop.permute.xlu1 %942 }
 0x7d2   :  { %v945_v30 = vmul.f32 %v943_v27, %v940_v25 }
 0x7d4   :  { %v2979_v31 = vadd.f32 %v946_v29, %v945_v30 }
 0x7d6   :  { %v948_v34 = vpack.c.bf16 %v2979_v31, %v2979_v31 }
 0x7d8   :  { %950 = vrot.lane.b32.xlu0 %v948_v34, %s2726_s0 }
 0x84a   :  { %v951_v35 = vpop.permute.xlu0 %950 }
 0x84b   :  { %2408 = vmatmul.mubr.msk.bf16.vlgmr.msra.gmra.mrb[32].mxu1 %vm122_vm3, %v951_v35  ;;  %2416 = vmatmul.mubr.msk.bf16.vlgmr.msra.gmra.mrb[44].mxu0 %vm122_vm3, %v951_v35 }
 0x84c   :  { %2420 = vmatpush3.bf16.msra.mxu1 %v2874_v26  ;;  %2423 = vmatprep.mubr.msk.bf16.mxu1 %vm2724_vm0, %v2723_v0 }
 0x84d   :  { %2421 = vmatprep.subr.bf16.mxu1 %v2723_v0  ;;  %2428 = vmatpush3.bf16.msra.mxu0 %v2836_v56 }
 0x84e   :  { %2429 = vmatprep.subr.bf16.mxu0 %v2723_v0  ;;  %2431 = vmatprep.mubr.msk.bf16.mxu0 %vm2724_vm0, %v2723_v0 }
 0x850   :  { %2422 = vmatpush3.bf16.msra.mxu1 %v2880_v32 }
 0x851   :  { %2435 = vmatprep.subr.bf16.mxu1 %v2723_v0  ;;  %2430 = vmatpush3.bf16.msra.mxu0 %v2849_v13 }
 0x852   :  { %2443 = vmatprep.subr.bf16.mxu0 %v2723_v0 }
 0x853   :  { %2424 = vmatmul.mubr.msk.bf16.vlgmr.msra.gmra.mrb[36].mxu1 %vm122_vm3, %v951_v35 }
 0x854   :  { %2436 = vmatpush3.bf16.msra.mxu1 %v2859_v20  ;;  %2439 = vmatprep.mubr.msk.bf16.mxu1 %vm2724_vm0, %v2723_v0 }
 0x855   :  { %2437 = vmatprep.subr.bf16.mxu1 %v2723_v0 }
 0x858   :  { %2438 = vmatpush3.bf16.msra.mxu1 %v2865_v23 }
 0x859   :  { %2451 = vmatprep.subr.bf16.mxu1 %v2723_v0 }
 0x91e   :  { %v989_v63 = vpop.f32.mrb[32].mxu1  ;;  %v1029_v36 = vpop.f32.mrb[44].mxu0 }
 0x91f   :  { %v1035_v37 = vadd.f32 %v989_v63, %v2934_v15  ;;  %v2409_v38 = vpop.f32.mrb[33].mxu1  ;;  %1043 = vrot.lane.b32.xlu0 %v1029_v36, %s2725_s2  ;;  %v2417_v39 = vpop.f32.mrb[45].mxu0 }
 0x920   :  { %v992_v41 = vpop.f32.mrb[34].mxu1  ;;  %v1032_v42 = vpop.f32.mrb[46].mxu0 }
 0x921   :  { %v2133_v43 = vmul.f32 -1.442695, %v1035_v37  ;;  %v2410_v44 = vpop.f32.mrb[35].mxu1  ;;  %v2418_v45 = vpop.f32.mrb[47].mxu0 }
 0x923   :  { %2632 = vpow2.f32 %v2133_v43 }
 0x926   :  { %v1087_v46 = vpop.f32.mrb[36].mxu1 }
 0x927   :  { %v2425_v49 = vpop.f32.mrb[37].mxu1  ;;  %v1088_v53 = vadd.f32 %v2929_v9, %v1087_v46 }
 0x928   :  { %v1090_v17 = vpop.f32.mrb[38].mxu1 }
 0x929   :  { %v2426_v50 = vpop.f32.mrb[39].mxu1 }
 0x92d   :  { %v2633_v51 = vpop.eup %2632 }
 0x92e   :  { %v1039_v52 = vadd.f32 1.0, %v2633_v51 }
 0x930   :  { %2634 = vrcp.f32 %v1039_v52 }
 0x93a   :  { %v2635_v54 = vpop.eup %2634 }
 0x93b   :  { %v1093_v55 = vmul.f32 %v2635_v54, %v1088_v53 }
 0x93d   :  { %1095 = vrot.lane.b32.xlu1 %v1093_v55, %s2721_s25 }
 0x991   :  { %v1044_v60 = vpop.permute.xlu0 %1043 }
 0x992   :  { %v1046_v61 = vadd.f32 %v1044_v60, %v2934_v15 }
 0x994   :  { %v2134_v62 = vmul.f32 -1.442695, %v1046_v61 }
 0x9af   :  { %v1096_v57 = vpop.permute.xlu1 %1095 }
 0x9b0   :  { %v1098_v58 = vadd.f32 %v1096_v57, %v2934_v15 }
 0x9b2   :  { %2636 = vtanh.f32 %v1098_v58 }
 0x9b3   :  { %2638 = vpow2.f32 %v2134_v62 }
 0x9bc   :  { %v2637_v59 = vpop.eup %2636 }
 0x9bd   :  { %1102 = vrot.lane.b32.xlu1 %v2637_v59, %s2726_s0  ;;  %v2639_v1 = vpop.eup %2638 }
 0x9be   :  { %v1050_v2 = vadd.f32 1.0, %v2639_v1 }
 0x9c0   :  { %2640 = vrcp.f32 %v1050_v2 }
 0x9ca   :  { %v2641_v3 = vpop.eup %2640 }
 0x9cb   :  { %v1100_v4 = vsub.f32 1.0, %v2641_v3  ;;  %v1106_v7 = vmul.f32 %v2641_v3, %v2979_v31 }
 0xa2f   :  { %v1103_v5 = vpop.permute.xlu1 %1102 }
 0xa30   :  { %v1105_v6 = vmul.f32 %v1103_v5, %v1100_v4 }
 0xa32   :  { %v3013_v8 = vadd.f32 %v1106_v7, %v1105_v6 }
 0xa34   :  { %v1108_v10 = vpack.c.bf16 %v3013_v8, %v3013_v8 }
 0xa36   :  { %1110 = vrot.lane.b32.xlu0 %v1108_v10, %s2726_s0 }
 0xaa8   :  { %v1111_v11 = vpop.permute.xlu0 %1110 }
 0xaa9   :  { %2432 = vmatmul.mubr.msk.bf16.vlgmr.msra.gmra.mrb[48].mxu0 %vm122_vm3, %v1111_v11  ;;  %2440 = vmatmul.mubr.msk.bf16.vlgmr.msra.gmra.mrb[40].mxu1 %vm122_vm3, %v1111_v11 }
 0xaaa   :  { %2444 = vmatpush3.bf16.msra.mxu0 %v2874_v26  ;;  %2447 = vmatprep.mubr.msk.bf16.mxu0 %vm2724_vm0, %v2723_v0 }
 0xaab   :  { %2445 = vmatprep.subr.bf16.mxu0 %v2723_v0  ;;  %2452 = vmatpush3.bf16.msra.mxu1 %v2836_v56 }
 0xaac   :  { %2453 = vmatprep.subr.bf16.mxu1 %v2723_v0  ;;  %2455 = vmatprep.mubr.msk.bf16.mxu1 %vm2724_vm0, %v2723_v0 }
 0xaae   :  { %2446 = vmatpush3.bf16.msra.mxu0 %v2880_v32 }
 0xaaf   :  { %2459 = vmatprep.subr.bf16.mxu0 %v2723_v0  ;;  %2454 = vmatpush3.bf16.msra.mxu1 %v2849_v13 }
 0xab0   :  { %2467 = vmatprep.subr.bf16.mxu1 %v2723_v0 }
 0xab1   :  { %2448 = vmatmul.mubr.msk.bf16.vlgmr.msra.gmra.mrb[52].mxu0 %vm122_vm3, %v1111_v11 }
 0xab2   :  { %2460 = vmatpush3.bf16.msra.mxu0 %v2859_v20  ;;  %2463 = vmatprep.mubr.msk.bf16.mxu0 %vm2724_vm0, %v2723_v0 }
 0xab3   :  { %2461 = vmatprep.subr.bf16.mxu0 %v2723_v0 }
 0xab6   :  { %2462 = vmatpush3.bf16.msra.mxu0 %v2865_v23 }
 0xab7   :  { %2475 = vmatprep.subr.bf16.mxu0 %v2723_v0 }
 0xb7c   :  { %v1149_v15 = vpop.f32.mrb[48].mxu0  ;;  %v1189_v12 = vpop.f32.mrb[40].mxu1 }
 0xb7d   :  { %v1195_v14 = vadd.f32 %v1149_v15, %v2936_v19  ;;  %1203 = vrot.lane.b32.xlu0 %v1189_v12, %s2725_s2  ;;  %v2433_v16 = vpop.f32.mrb[49].mxu0  ;;  %v2441_v18 = vpop.f32.mrb[41].mxu1 }
 0xb7e   :  { %v1152_v21 = vpop.f32.mrb[50].mxu0  ;;  %v1192_v22 = vpop.f32.mrb[42].mxu1 }
 0xb7f   :  { %v2138_v25 = vmul.f32 -1.442695, %v1195_v14  ;;  %v2434_v27 = vpop.f32.mrb[51].mxu0  ;;  %v2442_v29 = vpop.f32.mrb[43].mxu1 }
 0xb81   :  { %2642 = vpow2.f32 %v2138_v25 }
 0xb84   :  { %v1247_v30 = vpop.f32.mrb[52].mxu0 }
 0xb85   :  { %v2449_v34 = vpop.f32.mrb[53].mxu0  ;;  %v1248_v38 = vadd.f32 %v2929_v9, %v1247_v30 }
 0xb86   :  { %v1250_v35 = vpop.f32.mrb[54].mxu0 }
 0xb87   :  { %v2450_v63 = vpop.f32.mrb[55].mxu0 }
 0xb8b   :  { %v2643_v36 = vpop.eup %2642 }
 0xb8c   :  { %v1199_v37 = vadd.f32 1.0, %v2643_v36 }
 0xb8e   :  { %2644 = vrcp.f32 %v1199_v37 }
 0xb98   :  { %v2645_v39 = vpop.eup %2644 }
 0xb99   :  { %v1253_v41 = vmul.f32 %v2645_v39, %v1248_v38 }
 0xb9b   :  { %1255 = vrot.lane.b32.xlu1 %v1253_v41, %s2721_s25 }
 0xbef   :  { %v1204_v45 = vpop.permute.xlu0 %1203 }
 0xbf0   :  { %v1206_v46 = vadd.f32 %v1204_v45, %v2936_v19 }
 0xbf2   :  { %v2139_v49 = vmul.f32 -1.442695, %v1206_v46 }
 0xc0d   :  { %v1256_v42 = vpop.permute.xlu1 %1255 }
 0xc0e   :  { %v1258_v43 = vadd.f32 %v1256_v42, %v2936_v19 }
 0xc10   :  { %2646 = vtanh.f32 %v1258_v43 }
 0xc11   :  { %2648 = vpow2.f32 %v2139_v49 }
 0xc1a   :  { %v2647_v44 = vpop.eup %2646 }
 0xc1b   :  { %1262 = vrot.lane.b32.xlu1 %v2647_v44, %s2726_s0  ;;  %v2649_v17 = vpop.eup %2648 }
 0xc1c   :  { %v1210_v50 = vadd.f32 1.0, %v2649_v17 }
 0xc1e   :  { %2650 = vrcp.f32 %v1210_v50 }
 0xc28   :  { %v2651_v51 = vpop.eup %2650 }
 0xc29   :  { %v1260_v52 = vsub.f32 1.0, %v2651_v51  ;;  %v1266_v54 = vmul.f32 %v2651_v51, %v3013_v8  ;;  %v1592_v51 = vpack.c.bf16 %v2979_v31, %v2945_v48 }
 0xc8d   :  { %v1263_v53 = vpop.permute.xlu1 %1262 }
 0xc8e   :  { %v1265_v55 = vmul.f32 %v1263_v53, %v1260_v52 }
 0xc90   :  { %v3047_v57 = vadd.f32 %v1266_v54, %v1265_v55 }
 0xc92   :  { %v1268_v58 = vpack.c.bf16 %v3047_v57, %v3047_v57 }
 0xc94   :  { %1270 = vrot.lane.b32.xlu0 %v1268_v58, %s2726_s0 }
 0xd06   :  { %v1271_v59 = vpop.permute.xlu0 %1270 }
 0xd07   :  { %2456 = vmatmul.mubr.msk.bf16.vlgmr.msra.gmra.mrb[44].mxu1 %vm122_vm3, %v1271_v59  ;;  %2464 = vmatmul.mubr.msk.bf16.vlgmr.msra.gmra.mrb[56].mxu0 %vm122_vm3, %v1271_v59 }
 0xd08   :  { %2468 = vmatpush3.bf16.msra.mxu1 %v2874_v26  ;;  %2471 = vmatprep.mubr.msk.bf16.mxu1 %vm2724_vm0, %v2723_v0 }
 0xd09   :  { %2469 = vmatprep.subr.bf16.mxu1 %v2723_v0  ;;  %2476 = vmatpush3.bf16.msra.mxu0 %v2836_v56 }
 0xd0a   :  { %2477 = vmatprep.subr.bf16.mxu0 %v2723_v0  ;;  %2479 = vmatprep.mubr.msk.bf16.mxu0 %vm2724_vm0, %v2723_v0 }
 0xd0c   :  { %2470 = vmatpush3.bf16.msra.mxu1 %v2880_v32 }
 0xd0d   :  { %2483 = vmatprep.subr.bf16.mxu1 %v2723_v0  ;;  %2478 = vmatpush3.bf16.msra.mxu0 %v2849_v13 }
 0xd0e   :  { %2491 = vmatprep.subr.bf16.mxu0 %v2723_v0 }
 0xd0f   :  { %2472 = vmatmul.mubr.msk.bf16.vlgmr.msra.gmra.mrb[48].mxu1 %vm122_vm3, %v1271_v59 }
 0xd10   :  { %2484 = vmatpush3.bf16.msra.mxu1 %v2859_v20  ;;  %2487 = vmatprep.mubr.msk.bf16.mxu1 %vm2724_vm0, %v2723_v0 }
 0xd11   :  { %2485 = vmatprep.subr.bf16.mxu1 %v2723_v0 }
 0xd14   :  { %2486 = vmatpush3.bf16.msra.mxu1 %v2865_v23 }
 0xd15   :  { %2499 = vmatprep.subr.bf16.mxu1 %v2723_v0 }
 0xdda   :  { %v1309_v56 = vpop.f32.mrb[44].mxu1  ;;  %v1349_v19 = vpop.f32.mrb[56].mxu0 }
 0xddb   :  { %v1355_v60 = vadd.f32 %v1309_v56, %v2938_v24  ;;  %v2457_v13 = vpop.f32.mrb[45].mxu1  ;;  %1363 = vrot.lane.b32.xlu0 %v1349_v19, %s2725_s2  ;;  %v2465_v61 = vpop.f32.mrb[57].mxu0 }
 0xddc   :  { %v1312_v62 = vpop.f32.mrb[46].mxu1  ;;  %v1352_v1 = vpop.f32.mrb[58].mxu0 }
 0xddd   :  { %v2143_v20 = vmul.f32 -1.442695, %v1355_v60  ;;  %v2458_v2 = vpop.f32.mrb[47].mxu1  ;;  %v2466_v3 = vpop.f32.mrb[59].mxu0  ;;  %v2605_v1 = vld [vmem:[#allocation2 + $0x98] sm:$0xff]  }
 0xddf   :  { %2652 = vpow2.f32 %v2143_v20  ;;  %v2606_v20 = vld [vmem:[#allocation2 + $0xa0] sm:$0xff]  }
 0xde2   :  { %v1407_v4 = vpop.f32.mrb[48].mxu1 }
 0xde3   :  { %v2473_v5 = vpop.f32.mrb[49].mxu1  ;;  %v1408_v11 = vadd.f32 %v2929_v9, %v1407_v4 }
 0xde4   :  { %v1410_v6 = vpop.f32.mrb[50].mxu1 }
 0xde5   :  { %v2474_v23 = vpop.f32.mrb[51].mxu1  ;;  %v2607_v6 = vld [vmem:[#allocation2 + $0xb0] sm:$0xff]  }
 0xde9   :  { %v2653_v7 = vpop.eup %2652 }
 0xdea   :  { %v1359_v10 = vadd.f32 1.0, %v2653_v7 }
 0xdec   :  { %2654 = vrcp.f32 %v1359_v10 }
 0xdf6   :  { %v2655_v15 = vpop.eup %2654 }
 0xdf7   :  { %v1413_v12 = vmul.f32 %v2655_v15, %v1408_v11 }
 0xdf9   :  { %1415 = vrot.lane.b32.xlu1 %v1413_v12, %s2721_s25 }
 0xe4d   :  { %v1364_v21 = vpop.permute.xlu0 %1363 }
 0xe4e   :  { %v1366_v22 = vadd.f32 %v1364_v21, %v2938_v24 }
 0xe50   :  { %v2144_v25 = vmul.f32 -1.442695, %v1366_v22 }
 0xe6b   :  { %v1416_v14 = vpop.permute.xlu1 %1415 }
 0xe6c   :  { %v1418_v16 = vadd.f32 %v1416_v14, %v2938_v24  ;;  %v2603_v24 = vld [vmem:[#allocation2 + $0x88] sm:$0xff]  }
 0xe6d   :  { %v2151_v14 = vld [vmem:[%s3199_s3 + $0x8] ss:$0 sm:$0xff] }
 0xe6e   :  { %2656 = vtanh.f32 %v1418_v16 }
 0xe6f   :  { %2658 = vpow2.f32 %v2144_v25 }
 0xe78   :  { %v2657_v18 = vpop.eup %2656 }
 0xe79   :  { %1422 = vrot.lane.b32.xlu1 %v2657_v18, %s2726_s0  ;;  %v2659_v27 = vpop.eup %2658 }
 0xe7a   :  { %v1370_v29 = vadd.f32 1.0, %v2659_v27 }
 0xe7c   :  { %2660 = vrcp.f32 %v1370_v29 }
 0xe86   :  { %v2661_v30 = vpop.eup %2660 }
 0xe87   :  { %v1420_v34 = vsub.f32 1.0, %v2661_v30  ;;  %v1426_v36 = vmul.f32 %v2661_v30, %v3047_v57 }
 0xeeb   :  { %v1423_v35 = vpop.permute.xlu1 %1422 }
 0xeec   :  { %v1425_v63 = vmul.f32 %v1423_v35, %v1420_v34 }
 0xeee   :  { %v3081_v37 = vadd.f32 %v1426_v36, %v1425_v63  ;;  %v2609_v36 = vld [vmem:[#allocation2 + $0xa8] sm:$0xff]  }
 0xef0   :  { %v1428_v38 = vpack.c.bf16 %v3081_v37, %v3081_v37 }
 0xef2   :  { %1430 = vrot.lane.b32.xlu0 %v1428_v38, %s2726_s0 }
 0xf64   :  { %v1431_v39 = vpop.permute.xlu0 %1430 }
 0xf65   :  { %2480 = vmatmul.mubr.msk.bf16.vlgmr.msra.gmra.mrb[60].mxu0 %vm122_vm3, %v1431_v39  ;;  %2488 = vmatmul.mubr.msk.bf16.vlgmr.msra.gmra.mrb[52].mxu1 %vm122_vm3, %v1431_v39 }
 0xf66   :  { %2492 = vmatpush3.bf16.msra.mxu0 %v2874_v26  ;;  %2495 = vmatprep.mubr.msk.bf16.mxu0 %vm2724_vm0, %v2723_v0  ;;  %v2604_v26 = vld [vmem:[#allocation2 + $0x90] sm:$0xff]  }
 0xf67   :  { %2493 = vmatprep.subr.bf16.mxu0 %v2723_v0  ;;  %2503 = vmatprep.mubr.msk.bf16.mxu1 %vm2724_vm0, %v2723_v0 }
 0xf68   :  { %2500 = vmatpush3.bf16.msra.mxu1 %v2603_v24 }
 0xf69   :  { %2501 = vmatprep.subr.bf16.mxu1 %v2723_v0 }
 0xf6a   :  { %2494 = vmatpush3.bf16.msra.mxu0 %v2880_v32 }
 0xf6b   :  { %2515 = vmatprep.subr.bf16.mxu0 %v2723_v0 }
 0xf6c   :  { %2502 = vmatpush3.bf16.msra.mxu1 %v2604_v26 }
 0xf6d   :  { %2496 = vmatmul.mubr.msk.bf16.vlgmr.msra.gmra.mrb[64].mxu0 %vm122_vm3, %v1431_v39  ;;  %2531 = vmatprep.subr.bf16.mxu1 %v2723_v0 }
 0xf6e   :  { %2519 = vmatprep.mubr.msk.bf16.mxu0 %vm2724_vm0, %v2723_v0  ;;  %2516 = vmatpush3.bf16.msra.mxu0 %v2605_v1 }
 0xf6f   :  { %2517 = vmatprep.subr.bf16.mxu0 %v2723_v0 }
 0xf72   :  { %2518 = vmatpush3.bf16.msra.mxu0 %v2606_v20 }
 0xf73   :  { %2547 = vmatprep.subr.bf16.mxu0 %v2723_v0 }
0x1038   :  { %v1469_v41 = vpop.f32.mrb[60].mxu0  ;;  %v1509_v42 = vpop.f32.mrb[52].mxu1 }
0x1039   :  { %v1515_v43 = vadd.f32 %v1469_v41, %v2940_v28  ;;  %1523 = vrot.lane.b32.xlu0 %v1509_v42, %s2725_s2  ;;  %v2481_v32 = vpop.f32.mrb[61].mxu0  ;;  %v2489_v44 = vpop.f32.mrb[53].mxu1 }
0x103a   :  { %v1472_v45 = vpop.f32.mrb[62].mxu0  ;;  %v1512_v46 = vpop.f32.mrb[54].mxu1 }
0x103b   :  { %v2148_v49 = vmul.f32 -1.442695, %v1515_v43  ;;  %v2482_v17 = vpop.f32.mrb[63].mxu0  ;;  %v2490_v50 = vpop.f32.mrb[55].mxu1 }
0x103d   :  { %2662 = vpow2.f32 %v2148_v49  ;;  %1605 = vrot.lane.b32.xlu0 %v1592_v51, %s2726_s0 }
0x1040   :  { %v1567_v52 = vpop.f32.mrb[64].mxu0 }
0x1041   :  { %v2497_v53 = vpop.f32.mrb[65].mxu0  ;;  %v1568_v56 = vadd.f32 %v2929_v9, %v1567_v52  ;;  %v1593_v9 = vpack.c.bf16 %v3047_v57, %v3013_v8  ;;  %v2608_v8 = vld [vmem:[#allocation2 + $0xb8] sm:$0xff]  }
0x1042   :  { %v1570_v54 = vpop.f32.mrb[66].mxu0 }
0x1043   :  { %v2498_v55 = vpop.f32.mrb[67].mxu0 }
0x1047   :  { %v2663_v58 = vpop.eup %2662 }
0x1048   :  { %v1519_v59 = vadd.f32 1.0, %v2663_v58 }
0x104a   :  { %2664 = vrcp.f32 %v1519_v59 }
0x1054   :  { %v2665_v19 = vpop.eup %2664 }
0x1055   :  { %v1573_v60 = vmul.f32 %v2665_v19, %v1568_v56 }
0x1057   :  { %1575 = vrot.lane.b32.xlu1 %v1573_v60, %s2721_s25 }
0x10ab   :  { %v1524_v13 = vpop.permute.xlu0 %1523 }
0x10ac   :  { %v1526_v2 = vadd.f32 %v1524_v13, %v2940_v28 }
0x10ae   :  { %v2149_v3 = vmul.f32 -1.442695, %v1526_v2 }
0x10af   :  { %v1606_v61 = vpop.permute.xlu0 %1605 }
0x10b0   :  { %2504 = vmatmul.mubr.msk.bf16.vlgmr.msra.gmra.mrb[56].mxu1 %vm122_vm3, %v1606_v61 }
0x10b1   :  { %2507 = vmatprep.mubr.msk.bf16.mxu1 %vm2724_vm0, %v2723_v0  ;;  %2532 = vmatpush3.bf16.msra.mxu1 %v2607_v6 }
0x10b2   :  { %2533 = vmatprep.subr.bf16.mxu1 %v2723_v0 }
0x10b5   :  { %2534 = vmatpush3.bf16.msra.mxu1 %v2608_v8 }
0x10b6   :  { %2561 = vmatprep.subr.bf16.mxu1 %v2723_v0 }
0x10c9   :  { %v1576_v48 = vpop.permute.xlu1 %1575 }
0x10ca   :  { %v1578_v31 = vadd.f32 %v1576_v48, %v2940_v28 }
0x10cc   :  { %2666 = vtanh.f32 %v1578_v31 }
0x10cd   :  { %2668 = vpow2.f32 %v2149_v3  ;;  %v2610_v3 = vld [vmem:[#allocation2 + $0xc0] sm:$0xff]  }
0x10d6   :  { %v2667_v62 = vpop.eup %2666 }
0x10d7   :  { %1582 = vrot.lane.b32.xlu1 %v2667_v62, %s2726_s0  ;;  %v2669_v4 = vpop.eup %2668 }
0x10d8   :  { %v1530_v5 = vadd.f32 1.0, %v2669_v4 }
0x10da   :  { %2670 = vrcp.f32 %v1530_v5 }
0x10db   :  { %1607 = vrot.lane.b32.xlu1 %v1593_v9, %s2726_s0 }
0x10e4   :  { %v2671_v57 = vpop.eup %2670 }
0x10e5   :  { %v1580_v23 = vsub.f32 1.0, %v2671_v57  ;;  %v1586_v10 = vmul.f32 %v2671_v57, %v3081_v37 }
0x1149   :  { %v1583_v7 = vpop.permute.xlu1 %1582 }
0x114a   :  { %v1585_v11 = vmul.f32 %v1583_v7, %v1580_v23  ;;  %v2611_v7 = vld [vmem:[#allocation2 + $0xc8] sm:$0xff]  }
0x114c   :  { %v1587_v28 = vadd.f32 %v1586_v10, %v1585_v11 }
0x114d   :  { %v1608_v15 = vpop.permute.xlu1 %1607 }
0x114e   :  { %2508 = vmatmul.mubr.msk.bf16.gmra.mrb[60].mxu1 %vm122_vm3, %v1608_v15  ;;  %v1594_v12 = vpack.c.bf16 %v1587_v28, %v3081_v37 }
0x114f   :  { %2511 = vmatprep.mubr.msk.bf16.mxu1 %vm2724_vm0, %v2723_v0 }
0x1150   :  { %1609 = vrot.lane.b32.xlu0 %v1594_v12, %s2726_s0 }
0x1183   :  { %v1666_v16 = vpop.f32.mrb[56].mxu1 }
0x1184   :  { %v1667_v18 = vadd.f32 %v2151_v14, %v1666_v16  ;;  %v2505_v21 = vpop.f32.mrb[57].mxu1 }
0x1185   :  { %v1669_v22 = vpop.f32.mrb[58].mxu1 }
0x1186   :  { %v1670_v25 = vadd.f32 %v2151_v14, %v1669_v22  ;;  %v2506_v27 = vpop.f32.mrb[59].mxu1  ;;  %v1689_v29 = vmax.f32 %v1667_v18, 0.0  ;;  %v2172_v22 = vld [vmem:[%s3199_s3 + $0xa] ss:$0 sm:$0xff] }
0x1188   :  { %v1690_v30 = vmax.f32 %v1670_v25, 0.0 }
0x118a   :  { %v1699_v34 = vpack.c.bf16 %v1690_v30, %v1689_v29 }
0x118c   :  { %2520 = vmatmul.mubr.msk.bf16.vlgmr.msra.gmra.mrb[68].mxu0 %vm122_vm3, %v1699_v34 }
0x118d   :  { %2523 = vmatprep.mubr.msk.bf16.mxu0 %vm2724_vm0, %v2723_v0  ;;  %2548 = vmatpush3.bf16.msra.mxu0 %v2609_v36 }
0x11c2   :  { %v1610_v35 = vpop.permute.xlu0 %1609 }
0x11c3   :  { %2512 = vmatmul.mubr.msk.bf16.gmra.mrb[64].mxu1 %vm122_vm3, %v1610_v35 }
0x11c4   :  { %2535 = vmatprep.mubr.msk.bf16.mxu1 %vm2724_vm0, %v2723_v0 }
0x11cb   :  { %2536 = vmatmul.mubr.msk.bf16.vlgmr.msra.gmra.mrb[68].mxu1 %vm122_vm3, %v2884_v33 }
0x11cc   :  { %2539 = vmatprep.mubr.msk.bf16.mxu1 %vm2724_vm0, %v2723_v0  ;;  %2562 = vmatpush3.bf16.msra.mxu1 %v2610_v3 }
0x11cd   :  { %2563 = vmatprep.subr.bf16.mxu1 %v2723_v0 }
0x11d0   :  { %2564 = vmatpush3.bf16.msra.mxu1 %v2611_v7 }
0x11d3   :  { %2540 = vmatmul.mubr.msk.bf16.gmra.mrb[72].mxu1 %vm122_vm3, %v2901_v40 }
0x11d4   :  { %2543 = vmatprep.mubr.msk.bf16.mxu1 %vm2724_vm0, %v2723_v0 }
0x11db   :  { %2544 = vmatmul.mubr.msk.bf16.gmra.mrb[76].mxu1 %vm122_vm3, %v2914_v47  ;;  %v2157_v47 = vld [vmem:[%s3199_s3 + $0x9] ss:$0 sm:$0xff] }
0x11dc   :  { %2565 = vmatprep.mubr.msk.bf16.mxu1 %vm2724_vm0, %v2723_v0 }
0x1221   :  { %v1674_v63 = vpop.f32.mrb[60].mxu1 }
0x1222   :  { %v1675_v37 = vadd.f32 %v2151_v14, %v1674_v63  ;;  %v2509_v38 = vpop.f32.mrb[61].mxu1 }
0x1223   :  { %v1677_v33 = vpop.f32.mrb[62].mxu1 }
0x1224   :  { %v1678_v39 = vadd.f32 %v2151_v14, %v1677_v33  ;;  %v2510_v24 = vpop.f32.mrb[63].mxu1  ;;  %v1691_v26 = vmax.f32 %v1675_v37, 0.0 }
0x1226   :  { %v1692_v41 = vmax.f32 %v1678_v39, 0.0 }
0x1228   :  { %v1700_v40 = vpack.c.bf16 %v1692_v41, %v1691_v26 }
0x122a   :  { %2524 = vmatmul.mubr.msk.bf16.gmra.mrb[72].mxu0 %vm122_vm3, %v1700_v40 }
0x122b   :  { %2527 = vmatprep.mubr.msk.bf16.mxu0 %vm2724_vm0, %v2723_v0 }
0x125f   :  { %v1764_v42 = vpop.f32.mrb[68].mxu0 }
0x1260   :  { %v1765_v43 = vadd.f32 %v2157_v47, %v1764_v42  ;;  %v2521_v32 = vpop.f32.mrb[69].mxu0 }
0x1261   :  { %v1767_v44 = vpop.f32.mrb[70].mxu0 }
0x1262   :  { %2049 = vst.msk [vmem:[#allocation5 + $0x18] sm:$0xff] %vm182_vm4, %v1765_v43  ;;  %v1768_v45 = vadd.f32 %v2157_v47, %v1767_v44  ;;  %v2522_v46 = vpop.f32.mrb[71].mxu0 }
0x1264   :  { %v1789_v49 = vpack.c.bf16 %v1768_v45, %v1765_v43  ;;  %2050 = vst.msk [vmem:[#allocation5 + $0x30] sm:$0xff] %vm182_vm4, %v1768_v45 }
0x1296   :  { %v1682_v17 = vpop.f32.mrb[64].mxu1 }
0x1297   :  { %v1683_v50 = vadd.f32 %v2151_v14, %v1682_v17  ;;  %v2513_v51 = vpop.f32.mrb[65].mxu1 }
0x1298   :  { %v1685_v52 = vpop.f32.mrb[66].mxu1 }
0x1299   :  { %v1686_v53 = vadd.f32 %v2151_v14, %v1685_v52  ;;  %v2514_v54 = vpop.f32.mrb[67].mxu1  ;;  %v1693_v55 = vmax.f32 %v1683_v50, 0.0 }
0x129b   :  { %v1694_v58 = vmax.f32 %v1686_v53, 0.0 }
0x129d   :  { %v1701_v59 = vpack.c.bf16 %v1694_v58, %v1693_v55 }
0x129e   :  { %v1842_v56 = vpop.f32.mrb[68].mxu1 }
0x129f   :  { %2528 = vmatmul.mubr.msk.bf16.gmra.mrb[76].mxu0 %vm122_vm3, %v1701_v59  ;;  %v2537_v19 = vpop.f32.mrb[69].mxu1  ;;  %v2173_v59 = vld [vmem:[%s3199_s3 + $0xb] ss:$0 sm:$0xff]  ;;  %s2072_s3 = sshll.u32 %s2727_s12, 4  ;;  %s2073_s3 = int_to_ptr.vmem [resolvable:$true] %s2072_s3 }
0x12a0   :  { %v1845_v60 = vpop.f32.mrb[70].mxu1  ;;  %2549 = vmatprep.mubr.msk.bf16.mxu0 %vm2724_vm0, %v2723_v0  ;;  %s2694_s13 = scalar_lea.vmem %s2073_s3, 2688  ;;  %p2699_p9 = scmp.lt.s32.totalorder %s2073_s3, %s2073_s3 }
0x12a1   :  { %v2538_v13 = vpop.f32.mrb[71].mxu1  ;;  %p2695_p8 = scmp.ne.s32.totalorder %s2073_s3, %s2694_s13  ;;  %p2700_p10 = scmp.lt.s32.totalorder %s2694_s13, %s2694_s13 }
0x12a3   :  { %p2701_p11 = por %p2700_p10, %p2699_p9 }
0x12a5   :  { %p2702_p12 = pnand %p2701_p11, %p2695_p8 }
0x12a6   :  { %v1850_v61 = vpop.f32.mrb[72].mxu1 }
0x12a7   :  { %v2541_v48 = vpop.f32.mrb[73].mxu1  ;;  %2550 = vmatmul.mubr.msk.bf16.vlgmr.msra.gmra.mrb[80].mxu0 %vm182_vm4, %v1789_v49 }
0x12a8   :  { %v1853_v31 = vpop.f32.mrb[74].mxu1  ;;  %2553 = vmatprep.mubr.msk.bf16.mxu0 %vm2724_vm0, %v2723_v0 }
0x12a9   :  { %v2542_v62 = vpop.f32.mrb[75].mxu1 }
0x12ae   :  { %v1858_v9 = vpop.f32.mrb[76].mxu1 }
0x12af   :  { %v2545_v1 = vpop.f32.mrb[77].mxu1 }
0x12b0   :  { %v1861_v20 = vpop.f32.mrb[78].mxu1 }
0x12b1   :  { %v2546_v2 = vpop.f32.mrb[79].mxu1 }
0x12fd   :  { %v1772_v4 = vpop.f32.mrb[72].mxu0 }
0x12fe   :  { %v1773_v5 = vadd.f32 %v2157_v47, %v1772_v4  ;;  %v2525_v6 = vpop.f32.mrb[73].mxu0 }
0x12ff   :  { %v1775_v8 = vpop.f32.mrb[74].mxu0 }
0x1300   :  { %2051 = vst.msk [vmem:[#allocation5 + $0x48] sm:$0xff] %vm182_vm4, %v1773_v5  ;;  %v1776_v57 = vadd.f32 %v2157_v47, %v1775_v8  ;;  %v2526_v23 = vpop.f32.mrb[75].mxu0 }
0x1302   :  { %v1790_v10 = vpack.c.bf16 %v1776_v57, %v1773_v5  ;;  %2052 = vst.msk [vmem:[#allocation5 + $0x60] sm:$0xff] %vm182_vm4, %v1776_v57 }
0x1304   :  { %2554 = vmatmul.mubr.msk.bf16.gmra.mrb[84].mxu0 %vm182_vm4, %v1790_v10 }
0x1305   :  { %2557 = vmatprep.mubr.msk.bf16.mxu0 %vm2724_vm0, %v2723_v0 }
0x1372   :  { %v1780_v11 = vpop.f32.mrb[76].mxu0 }
0x1373   :  { %v1781_v28 = vadd.f32 %v2157_v47, %v1780_v11  ;;  %v2529_v15 = vpop.f32.mrb[77].mxu0 }
0x1374   :  { %v1783_v12 = vpop.f32.mrb[78].mxu0 }
0x1375   :  { %2053 = vst.msk [vmem:[#allocation5 + $0x78] sm:$0xff] %vm182_vm4, %v1781_v28  ;;  %v1784_v14 = vadd.f32 %v2157_v47, %v1783_v12  ;;  %v2530_v16 = vpop.f32.mrb[79].mxu0 }
0x1377   :  { %v1791_v18 = vpack.c.bf16 %v1784_v14, %v1781_v28  ;;  %2054 = vst.msk [vmem:[#allocation5 + $0x90] sm:$0xff] %vm182_vm4, %v1784_v14 }
0x1379   :  { %2558 = vmatmul.mubr.msk.bf16.gmra.mrb[88].mxu0 %vm182_vm4, %v1791_v18 }
0x137a   :  { %v1914_v21 = vpop.f32.mrb[80].mxu0 }
0x137b   :  { %v1915_v25 = vadd.f32 %v1914_v21, %v1842_v56  ;;  %v2551_v27 = vpop.f32.mrb[81].mxu0 }
0x137c   :  { %v1917_v29 = vpop.f32.mrb[82].mxu0 }
0x137d   :  { %v1944_v30 = vadd.f32 %v2172_v22, %v1915_v25  ;;  %v1918_v34 = vadd.f32 %v1917_v29, %v1845_v60  ;;  %v2552_v35 = vpop.f32.mrb[83].mxu0 }
0x137f   :  { %v1945_v63 = vadd.f32 %v2172_v22, %v1918_v34  ;;  %v1950_v36 = vmax.f32 %v1944_v30, 0.0 }
0x1381   :  { %v1951_v37 = vmax.f32 %v1945_v63, 0.0 }
0x1383   :  { %v1960_v38 = vpack.c.bf16 %v1951_v37, %v1950_v36 }
0x1385   :  { %2566 = vmatmul.mubr.msk.bf16.vlgmr.msra.gmra.mrb[80].mxu1 %vm122_vm3, %v1960_v38 }
0x1386   :  { %2569 = vmatprep.mubr.msk.bf16.mxu1 %vm2724_vm0, %v2723_v0 }
0x13d7   :  { %v1922_v33 = vpop.f32.mrb[84].mxu0 }
0x13d8   :  { %v1923_v39 = vadd.f32 %v1922_v33, %v1850_v61  ;;  %v2555_v24 = vpop.f32.mrb[85].mxu0 }
0x13d9   :  { %v1925_v26 = vpop.f32.mrb[86].mxu0 }
0x13da   :  { %v1946_v41 = vadd.f32 %v2172_v22, %v1923_v39  ;;  %v1926_v40 = vadd.f32 %v1925_v26, %v1853_v31  ;;  %v2556_v47 = vpop.f32.mrb[87].mxu0 }
0x13dc   :  { %v1947_v42 = vadd.f32 %v2172_v22, %v1926_v40  ;;  %v1952_v43 = vmax.f32 %v1946_v41, 0.0 }
0x13de   :  { %v1953_v32 = vmax.f32 %v1947_v42, 0.0 }
0x13e0   :  { %v1961_v44 = vpack.c.bf16 %v1953_v32, %v1952_v43 }
0x13e2   :  { %2570 = vmatmul.mubr.msk.bf16.gmra.mrb[84].mxu1 %vm122_vm3, %v1961_v44 }
0x13e3   :  { %2573 = vmatprep.mubr.msk.bf16.mxu1 %vm2724_vm0, %v2723_v0 }
0x144c   :  { %v1930_v45 = vpop.f32.mrb[88].mxu0 }
0x144d   :  { %v1931_v46 = vadd.f32 %v1930_v45, %v1858_v9  ;;  %v2559_v49 = vpop.f32.mrb[89].mxu0 }
0x144e   :  { %v1933_v17 = vpop.f32.mrb[90].mxu0 }
0x144f   :  { %v1948_v50 = vadd.f32 %v2172_v22, %v1931_v46  ;;  %v1934_v51 = vadd.f32 %v1933_v17, %v1861_v20  ;;  %v2560_v52 = vpop.f32.mrb[91].mxu0 }
0x1451   :  { %v1949_v53 = vadd.f32 %v2172_v22, %v1934_v51  ;;  %v1954_v54 = vmax.f32 %v1948_v50, 0.0 }
0x1453   :  { %v1955_v55 = vmax.f32 %v1949_v53, 0.0 }
0x1455   :  { %v1962_v58 = vpack.c.bf16 %v1955_v55, %v1954_v54 }
0x1457   :  { %2574 = vmatmul.mubr.msk.bf16.gmra.mrb[88].mxu1 %vm122_vm3, %v1962_v58 }
0x1458   :  { %v2025_v56 = vpop.f32.mrb[80].mxu1 }
0x1459   :  { %v2026_v19 = vadd.f32 %v2173_v59, %v2025_v56  ;;  %v2567_v0 = vpop.f32.mrb[81].mxu1 }
0x145a   :  { %v2028_v60 = vpop.f32.mrb[82].mxu1 }
0x145b   :  { %2061 = vst [vmem:[#allocation5 + $0x28] sm:$0xff] %v2026_v19  ;;  %v2029_v13 = vadd.f32 %v2173_v59, %v2028_v60  ;;  %v2568_v61 = vpop.f32.mrb[83].mxu1 }
0x145d   :  { %2062 = vst [vmem:[#allocation5 + $0x40] sm:$0xff] %v2029_v13 }
0x14b5   :  { %v2033_v48 = vpop.f32.mrb[84].mxu1 }
0x14b6   :  { %v2034_v31 = vadd.f32 %v2173_v59, %v2033_v48  ;;  %v2571_v62 = vpop.f32.mrb[85].mxu1 }
0x14b7   :  { %v2036_v9 = vpop.f32.mrb[86].mxu1 }
0x14b8   :  { %2063 = vst [vmem:[#allocation5 + $0x58] sm:$0xff] %v2034_v31  ;;  %v2037_v1 = vadd.f32 %v2173_v59, %v2036_v9  ;;  %v2572_v20 = vpop.f32.mrb[87].mxu1 }
0x14ba   :  { %2064 = vst [vmem:[#allocation5 + $0x70] sm:$0xff] %v2037_v1 }
0x152a   :  { %v2041_v2 = vpop.f32.mrb[88].mxu1 }
0x152b   :  { %v2042_v3 = vadd.f32 %v2173_v59, %v2041_v2  ;;  %v2575_v4 = vpop.f32.mrb[89].mxu1 }
0x152c   :  { %v2044_v5 = vpop.f32.mrb[90].mxu1 }
0x152d   :  { %2065 = vst [vmem:[#allocation5 + $0x88] sm:$0xff] %v2042_v3  ;;  %v2045_v6 = vadd.f32 %v2173_v59, %v2044_v5  ;;  %v2576_v8 = vpop.f32.mrb[91].mxu1 }
0x152f   :  { %2066 = vst [vmem:[#allocation5 + $0xa0] sm:$0xff] %v2045_v6 }
0x1530   :  { %2705 = shalt.err (!%p2702_p12)
}
0x1531   :  { %s2706_s16 = scalar_lea.hbm %s3200_s4, 2688 }
0x1532   :  { %p2707_p13 = scmp.ne.s32.totalorder %s3200_s4, %s2706_s16  ;;  %p2710_p0 = scmp.lt.u32.totalorder %s2706_s16, %s3200_s4 }
0x1534   :  { %p2712_p1 = pnand %p2710_p0, %p2707_p13 }
0x1536   :  { %2715 = shalt.err (!%p2712_p1)
}
0x1537   :  { %s2728_s1 = smov 384   ;;  %s2729_s21 = smov 24  }
0x1538   :  { %2078 = dma.vmem_to_hbm [thread:$0]  %s2073_s3, 2688, %s3200_s4, [#allocation4], %s2728_s1, %s2728_s1, %s2729_s21  }
0x1539   :  { %2718 = dma.done.wait [#allocation4], 2688  }
0x153a   :  { %2719 = vsyncadd [#allocation4], 4294964608 }
0x153b   :  { %2082 = vsyncpa [#allocation3], 1 }
0x153c   :  { %2083 = vsyncpa [#allocation4], 1 }

</bundles_post_ra>
